<compile_context>
chip_gen: v7x
topology: tpu7x:2x2x1
jax: 0.10.0
libtpu: 0.0.40
codegen_flags: <defaults>
</compile_context>

<pallas_src>
import jax
import jax.numpy as jnp
from jax import lax
from jax.experimental import pallas as pl
from jax.experimental.pallas import tpu as pltpu

DILATIONS = (1, 2, 3)


# ------------------------------ in-kernel helpers ---------------------------- #

def _shift_lanes(a, s):
    """t[:, n] = a[:, n + s] with zeros where n + s falls outside [0, S)."""
    if s == 0:
        return a
    P, S = a.shape
    pad = jnp.zeros((P, abs(s)), a.dtype)
    if s > 0:
        return jnp.concatenate([a[:, s:], pad], axis=1)
    return jnp.concatenate([pad, a[:, :S + s]], axis=1)


def _taps(a, coord, L, d, stride):
    """Stack the 3 dilated-conv taps of `a` (shape (P, S), lanes = flattened D*H*W)
    along the contraction dim -> (3P, S).

    coord: (1, S) int32 position along the conv axis (length L);
    stride: lane distance of one step along that axis.
    Row blocks are ordered [offset -d, offset 0, offset +d] to match the folded weights.
    """
    m_lo = (coord >= d).astype(a.dtype)        # offset -d in range
    m_hi = (coord < (L - d)).astype(a.dtype)   # offset +d in range
    t_lo = _shift_lanes(a, -d * stride) * m_lo
    t_hi = _shift_lanes(a, d * stride) * m_hi
    return jnp.concatenate([t_lo, a, t_hi], axis=0)


# --------------------------------- the kernel -------------------------------- #

def _make_kernel(dims, dilations):
    D_, H, W = dims

    def kernel(x_ref, didx_ref, hidx_ref, widx_ref, *refs):
        o_ref = refs[-1]
        prefs = refs[:-1]

        didx = didx_ref[...]            # (1, S) int32
        hidx = hidx_ref[...]
        widx = widx_ref[...]

        act = x_ref[0]                  # (C, S) f32, channels on sublanes, space on lanes
        for blk, d in enumerate(dilations):
            w1, b1, w2, b2, w3, b3, w4, b4, w5, b5 = (
                prefs[10 * blk + i][...] for i in range(10))

            # conv1 1x1x1 (C -> P), bn folded into w1, relu
            out1 = jnp.maximum(
                jnp.dot(w1, act, preferred_element_type=jnp.float32) + b1, 0.0)

            # conv2: (1,1,3) along W, dilation d — single (P,3P)@(3P,S) matmul
            t2 = _taps(out1, widx, W, d, 1)
            out2 = jnp.dot(w2, t2, preferred_element_type=jnp.float32) + b2

            # conv3: (1,3,1) along H on relu(out2), + out2
            t3 = _taps(jnp.maximum(out2, 0.0), hidx, H, d, W)
            out3 = jnp.dot(w3, t3, preferred_element_type=jnp.float32) + b3 + out2

            # conv4: (3,1,1) along D on relu(out3), + out2 + out3
            t4 = _taps(jnp.maximum(out3, 0.0), didx, D_, d, W * H)
            out4 = (jnp.dot(w4, t4, preferred_element_type=jnp.float32) + b4
                    + out2 + out3)

            # conv5 1x1x1 (P -> C), + residual, relu
            out5 = jnp.dot(w5, jnp.maximum(out4, 0.0),
                           preferred_element_type=jnp.float32) + b5
            act = jnp.maximum(out5 + act, 0.0)

        o_ref[0] = act.astype(o_ref.dtype)

    return kernel


# --------------------------- parameter preparation --------------------------- #

def _prep_block_params(p):
    """Raw params -> transposed, BN-scale-folded kernel operands (10 arrays)."""
    def fold_pw(w, s, b):
        # w: (Cin, Cout), s/b: (1, Cout) -> W^T*scale (Cout, Cin), bias (Cout, 1)
        return (w * s).T, b.reshape(-1, 1)

    def fold_ax(w, s, b):
        # w: (3, P, P) [tap, in, out] -> (P, 3P) = concat_k (w[k]*s)^T ; bias (P, 1)
        wt = jnp.concatenate([(w[k] * s).T for k in range(3)], axis=1)
        return wt, b.reshape(-1, 1)

    out = []
    out += fold_pw(p["w1"], p["s1"], p["b1"])
    out += fold_ax(p["w2"], p["s2"], p["b2"])
    out += fold_ax(p["w3"], p["s3"], p["b3"])
    out += fold_ax(p["w4"], p["s4"], p["b4"])
    out += fold_pw(p["w5"], p["s5"], p["b5"])
    return out


def _spatial_coords(D_, H, W):
    dd, hh, ww = jnp.meshgrid(
        jnp.arange(D_, dtype=jnp.int32),
        jnp.arange(H, dtype=jnp.int32),
        jnp.arange(W, dtype=jnp.int32), indexing="ij")
    S = D_ * H * W
    return dd.reshape(1, S), hh.reshape(1, S), ww.reshape(1, S)


# --------------------------------- wrapper ----------------------------------- #

@jax.jit
def process_kitti(x_ncdhw, params_list):
    B, C, D_, H, W = x_ncdhw.shape
    assert C % 4 == 0
    S = D_ * H * W

    # NCDHW flattens directly to the kernel's (B, C, S) layout -- no transpose needed.
    x = x_ncdhw.reshape(B, C, S)
    didx, hidx, widx = _spatial_coords(D_, H, W)

    flat_params = []
    for p in params_list:
        flat_params += _prep_block_params(p)

    slab_spec = pl.BlockSpec((1, C, S), lambda b: (b, 0, 0))
    coord_spec = pl.BlockSpec((1, S), lambda b: (0, 0))
    param_specs = [pl.BlockSpec(w.shape, lambda b: (0, 0)) for w in flat_params]

    y = pl.pallas_call(
        _make_kernel((D_, H, W), DILATIONS),
        out_shape=jax.ShapeDtypeStruct((B, C, S), jnp.float32),
        grid_spec=pltpu.PrefetchScalarGridSpec(
            num_scalar_prefetch=0,
            grid=(B,),
            in_specs=[slab_spec, coord_spec, coord_spec, coord_spec] + param_specs,
            out_specs=slab_spec,
        ),
        compiler_params=pltpu.CompilerParams(
            dimension_semantics=("parallel",),
            vmem_limit_bytes=32 * 1024 * 1024,
        ),
    )(x, didx, hidx, widx, *flat_params)

    return y.reshape(B, C, D_, H, W)


# --------------------------- parameter construction -------------------------- #

def _fold_bn(key, c):
    kg, kb, km, kv = jax.random.split(key, 4)
    gamma = 1.0 + 0.1 * jax.random.normal(kg, (c,), jnp.float32)
    beta = 0.1 * jax.random.normal(kb, (c,), jnp.float32)
    mean = 0.1 * jax.random.normal(km, (c,), jnp.float32)
    var = jax.random.uniform(kv, (c,), jnp.float32, 0.5, 1.5)
    eps = 1e-5  # nn.BatchNorm3d default
    scale = gamma / jnp.sqrt(var + eps)
    bias = beta - mean * scale
    return scale.reshape(1, c), bias.reshape(1, c)


def init_block(key, C):
    P = C // 4
    ks = jax.random.split(key, 10)
    p = {}
    p["w1"] = jax.random.normal(ks[0], (C, P), jnp.float32) / jnp.sqrt(C)         # conv1 (1,1,1)
    p["s1"], p["b1"] = _fold_bn(ks[1], P)
    p["w2"] = jax.random.normal(ks[2], (3, P, P), jnp.float32) / jnp.sqrt(3 * P)  # conv2 (1,1,3)
    p["s2"], p["b2"] = _fold_bn(ks[3], P)
    p["w3"] = jax.random.normal(ks[4], (3, P, P), jnp.float32) / jnp.sqrt(3 * P)  # conv3 (1,3,1)
    p["s3"], p["b3"] = _fold_bn(ks[5], P)
    p["w4"] = jax.random.normal(ks[6], (3, P, P), jnp.float32) / jnp.sqrt(3 * P)  # conv4 (3,1,1)
    p["s4"], p["b4"] = _fold_bn(ks[7], P)
    p["w5"] = jax.random.normal(ks[8], (P, C), jnp.float32) / jnp.sqrt(P)         # conv5 (1,1,1)
    p["s5"], p["b5"] = _fold_bn(ks[9], C)
    return p


# ------------------------------ pure-JAX reference --------------------------- #

def _conv_axial_ref(x5, w, axis, d):
    kshape = [1, 1, 1]
    kshape[axis - 1] = 3
    rhs = w.reshape(*kshape, w.shape[1], w.shape[2])
    rdil = [1, 1, 1]
    rdil[axis - 1] = d
    pad = [(0, 0), (0, 0), (0, 0)]
    pad[axis - 1] = (d, d)
    return lax.conv_general_dilated(
        x5, rhs, window_strides=(1, 1, 1), padding=pad, rhs_dilation=tuple(rdil),
        dimension_numbers=("NDHWC", "DHWIO", "NDHWC"))


def bottleneck3d_ref(x, p, d):
    bn = lambda y, s, b: y * s.reshape(1, 1, 1, 1, -1) + b.reshape(1, 1, 1, 1, -1)
    relu = lambda v: jnp.maximum(v, 0.0)
    out1 = relu(bn(jnp.einsum("bdhwc,cp->bdhwp", x, p["w1"]), p["s1"], p["b1"]))
    out2 = bn(_conv_axial_ref(out1, p["w2"], 3, d), p["s2"], p["b2"])
    out3 = bn(_conv_axial_ref(relu(out2), p["w3"], 2, d), p["s3"], p["b3"]) + out2
    out4 = bn(_conv_axial_ref(relu(out3), p["w4"], 1, d), p["s4"], p["b4"]) + out2 + out3
    out5 = bn(jnp.einsum("bdhwp,pc->bdhwc", relu(out4), p["w5"]), p["s5"], p["b5"])
    return relu(out5 + x)


# ----------------------------------- main ------------------------------------ #

if __name__ == "__main__":
    key = jax.random.PRNGKey(0)
    B, C, D, H, W = 2, 32, 8, 8, 8     # feature = 32 -> planes = 8
    kx, kp = jax.random.split(key)
    x = jax.random.normal(kx, (B, C, D, H, W), jnp.float32)
    params = [init_block(k, C) for k in jax.random.split(kp, 3)]

    out = jax.block_until_ready(process_kitti(x, params))

    # numerical sanity check vs a pure-JAX implementation of the same forward
    xr = jnp.transpose(x, (0, 2, 3, 4, 1))
    for p, d in zip(params, DILATIONS):
        xr = bottleneck3d_ref(xr, p, d)
    ref = jnp.transpose(xr, (0, 4, 1, 2, 3))

    assert out.shape == (B, C, D, H, W)
    err = float(jnp.max(jnp.abs(out - ref)))
    assert bool(jnp.allclose(out, ref, rtol=5e-2, atol=5e-2)), err
    print("KERNEL_OK")
</pallas_src>

<mosaic_0001>
module attributes {stable_mosaic.version = 11 : i64} {
  func.func @kernel(%arg0: i32, %arg1: memref<1x32x512xf32, #tpu.memory_space<vmem>>, %arg2: memref<1x512xi32, #tpu.memory_space<vmem>>, %arg3: memref<1x512xi32, #tpu.memory_space<vmem>>, %arg4: memref<1x512xi32, #tpu.memory_space<vmem>>, %arg5: memref<8x32xf32, #tpu.memory_space<vmem>>, %arg6: memref<8x1xf32, #tpu.memory_space<vmem>>, %arg7: memref<8x24xf32, #tpu.memory_space<vmem>>, %arg8: memref<8x1xf32, #tpu.memory_space<vmem>>, %arg9: memref<8x24xf32, #tpu.memory_space<vmem>>, %arg10: memref<8x1xf32, #tpu.memory_space<vmem>>, %arg11: memref<8x24xf32, #tpu.memory_space<vmem>>, %arg12: memref<8x1xf32, #tpu.memory_space<vmem>>, %arg13: memref<32x8xf32, #tpu.memory_space<vmem>>, %arg14: memref<32x1xf32, #tpu.memory_space<vmem>>, %arg15: memref<8x32xf32, #tpu.memory_space<vmem>>, %arg16: memref<8x1xf32, #tpu.memory_space<vmem>>, %arg17: memref<8x24xf32, #tpu.memory_space<vmem>>, %arg18: memref<8x1xf32, #tpu.memory_space<vmem>>, %arg19: memref<8x24xf32, #tpu.memory_space<vmem>>, %arg20: memref<8x1xf32, #tpu.memory_space<vmem>>, %arg21: memref<8x24xf32, #tpu.memory_space<vmem>>, %arg22: memref<8x1xf32, #tpu.memory_space<vmem>>, %arg23: memref<32x8xf32, #tpu.memory_space<vmem>>, %arg24: memref<32x1xf32, #tpu.memory_space<vmem>>, %arg25: memref<8x32xf32, #tpu.memory_space<vmem>>, %arg26: memref<8x1xf32, #tpu.memory_space<vmem>>, %arg27: memref<8x24xf32, #tpu.memory_space<vmem>>, %arg28: memref<8x1xf32, #tpu.memory_space<vmem>>, %arg29: memref<8x24xf32, #tpu.memory_space<vmem>>, %arg30: memref<8x1xf32, #tpu.memory_space<vmem>>, %arg31: memref<8x24xf32, #tpu.memory_space<vmem>>, %arg32: memref<8x1xf32, #tpu.memory_space<vmem>>, %arg33: memref<32x8xf32, #tpu.memory_space<vmem>>, %arg34: memref<32x1xf32, #tpu.memory_space<vmem>>, %arg35: memref<1x32x512xf32, #tpu.memory_space<vmem>>) attributes {dimension_semantics = [#tpu.dimension_semantics<parallel>], iteration_bounds = array<i64: 2>, scalar_prefetch = 0 : i64, scratch_operands = 0 : i64, tpu.core_type = #tpu.core_type<tc>, window_params = [{transform_indices = @transform_0, window_bounds = array<i64: 1, 32, 512>}, {pipeline_mode = #tpu.pipeline_mode<synchronous>, transform_indices = @transform_1, window_bounds = array<i64: 1, 512>}, {pipeline_mode = #tpu.pipeline_mode<synchronous>, transform_indices = @transform_2, window_bounds = array<i64: 1, 512>}, {pipeline_mode = #tpu.pipeline_mode<synchronous>, transform_indices = @transform_3, window_bounds = array<i64: 1, 512>}, {pipeline_mode = #tpu.pipeline_mode<synchronous>, transform_indices = @transform_4, window_bounds = array<i64: 8, 32>}, {pipeline_mode = #tpu.pipeline_mode<synchronous>, transform_indices = @transform_5, window_bounds = array<i64: 8, 1>}, {pipeline_mode = #tpu.pipeline_mode<synchronous>, transform_indices = @transform_6, window_bounds = array<i64: 8, 24>}, {pipeline_mode = #tpu.pipeline_mode<synchronous>, transform_indices = @transform_7, window_bounds = array<i64: 8, 1>}, {pipeline_mode = #tpu.pipeline_mode<synchronous>, transform_indices = @transform_8, window_bounds = array<i64: 8, 24>}, {pipeline_mode = #tpu.pipeline_mode<synchronous>, transform_indices = @transform_9, window_bounds = array<i64: 8, 1>}, {pipeline_mode = #tpu.pipeline_mode<synchronous>, transform_indices = @transform_10, window_bounds = array<i64: 8, 24>}, {pipeline_mode = #tpu.pipeline_mode<synchronous>, transform_indices = @transform_11, window_bounds = array<i64: 8, 1>}, {pipeline_mode = #tpu.pipeline_mode<synchronous>, transform_indices = @transform_12, window_bounds = array<i64: 32, 8>}, {pipeline_mode = #tpu.pipeline_mode<synchronous>, transform_indices = @transform_13, window_bounds = array<i64: 32, 1>}, {pipeline_mode = #tpu.pipeline_mode<synchronous>, transform_indices = @transform_14, window_bounds = array<i64: 8, 32>}, {pipeline_mode = #tpu.pipeline_mode<synchronous>, transform_indices = @transform_15, window_bounds = array<i64: 8, 1>}, {pipeline_mode = #tpu.pipeline_mode<synchronous>, transform_indices = @transform_16, window_bounds = array<i64: 8, 24>}, {pipeline_mode = #tpu.pipeline_mode<synchronous>, transform_indices = @transform_17, window_bounds = array<i64: 8, 1>}, {pipeline_mode = #tpu.pipeline_mode<synchronous>, transform_indices = @transform_18, window_bounds = array<i64: 8, 24>}, {pipeline_mode = #tpu.pipeline_mode<synchronous>, transform_indices = @transform_19, window_bounds = array<i64: 8, 1>}, {pipeline_mode = #tpu.pipeline_mode<synchronous>, transform_indices = @transform_20, window_bounds = array<i64: 8, 24>}, {pipeline_mode = #tpu.pipeline_mode<synchronous>, transform_indices = @transform_21, window_bounds = array<i64: 8, 1>}, {pipeline_mode = #tpu.pipeline_mode<synchronous>, transform_indices = @transform_22, window_bounds = array<i64: 32, 8>}, {pipeline_mode = #tpu.pipeline_mode<synchronous>, transform_indices = @transform_23, window_bounds = array<i64: 32, 1>}, {pipeline_mode = #tpu.pipeline_mode<synchronous>, transform_indices = @transform_24, window_bounds = array<i64: 8, 32>}, {pipeline_mode = #tpu.pipeline_mode<synchronous>, transform_indices = @transform_25, window_bounds = array<i64: 8, 1>}, {pipeline_mode = #tpu.pipeline_mode<synchronous>, transform_indices = @transform_26, window_bounds = array<i64: 8, 24>}, {pipeline_mode = #tpu.pipeline_mode<synchronous>, transform_indices = @transform_27, window_bounds = array<i64: 8, 1>}, {pipeline_mode = #tpu.pipeline_mode<synchronous>, transform_indices = @transform_28, window_bounds = array<i64: 8, 24>}, {pipeline_mode = #tpu.pipeline_mode<synchronous>, transform_indices = @transform_29, window_bounds = array<i64: 8, 1>}, {pipeline_mode = #tpu.pipeline_mode<synchronous>, transform_indices = @transform_30, window_bounds = array<i64: 8, 24>}, {pipeline_mode = #tpu.pipeline_mode<synchronous>, transform_indices = @transform_31, window_bounds = array<i64: 8, 1>}, {pipeline_mode = #tpu.pipeline_mode<synchronous>, transform_indices = @transform_32, window_bounds = array<i64: 32, 8>}, {pipeline_mode = #tpu.pipeline_mode<synchronous>, transform_indices = @transform_33, window_bounds = array<i64: 32, 1>}, {transform_indices = @transform_34, window_bounds = array<i64: 1, 32, 512>}]} {
    %c0 = arith.constant 0 : index
    %c0_0 = arith.constant 0 : index
    %0 = vector.load %arg2[%c0, %c0_0] : memref<1x512xi32, #tpu.memory_space<vmem>>, vector<1x512xi32>
    %c0_1 = arith.constant 0 : index
    %c0_2 = arith.constant 0 : index
    %1 = vector.load %arg3[%c0_1, %c0_2] : memref<1x512xi32, #tpu.memory_space<vmem>>, vector<1x512xi32>
    %c0_3 = arith.constant 0 : index
    %c0_4 = arith.constant 0 : index
    %2 = vector.load %arg4[%c0_3, %c0_4] : memref<1x512xi32, #tpu.memory_space<vmem>>, vector<1x512xi32>
    %c0_5 = arith.constant 0 : index
    %c0_6 = arith.constant 0 : index
    %c0_7 = arith.constant 0 : index
    %3 = vector.load %arg1[%c0_5, %c0_6, %c0_7] : memref<1x32x512xf32, #tpu.memory_space<vmem>>, vector<1x32x512xf32>
    %4 = vector.shape_cast %3 : vector<1x32x512xf32> to vector<32x512xf32>
    %c0_8 = arith.constant 0 : index
    %c0_9 = arith.constant 0 : index
    %5 = vector.load %arg5[%c0_8, %c0_9] : memref<8x32xf32, #tpu.memory_space<vmem>>, vector<8x32xf32>
    %c0_10 = arith.constant 0 : index
    %c0_11 = arith.constant 0 : index
    %6 = vector.load %arg6[%c0_10, %c0_11] : memref<8x1xf32, #tpu.memory_space<vmem>>, vector<8x1xf32>
    %c0_12 = arith.constant 0 : index
    %c0_13 = arith.constant 0 : index
    %7 = vector.load %arg7[%c0_12, %c0_13] : memref<8x24xf32, #tpu.memory_space<vmem>>, vector<8x24xf32>
    %c0_14 = arith.constant 0 : index
    %c0_15 = arith.constant 0 : index
    %8 = vector.load %arg8[%c0_14, %c0_15] : memref<8x1xf32, #tpu.memory_space<vmem>>, vector<8x1xf32>
    %c0_16 = arith.constant 0 : index
    %c0_17 = arith.constant 0 : index
    %9 = vector.load %arg9[%c0_16, %c0_17] : memref<8x24xf32, #tpu.memory_space<vmem>>, vector<8x24xf32>
    %c0_18 = arith.constant 0 : index
    %c0_19 = arith.constant 0 : index
    %10 = vector.load %arg10[%c0_18, %c0_19] : memref<8x1xf32, #tpu.memory_space<vmem>>, vector<8x1xf32>
    %c0_20 = arith.constant 0 : index
    %c0_21 = arith.constant 0 : index
    %11 = vector.load %arg11[%c0_20, %c0_21] : memref<8x24xf32, #tpu.memory_space<vmem>>, vector<8x24xf32>
    %c0_22 = arith.constant 0 : index
    %c0_23 = arith.constant 0 : index
    %12 = vector.load %arg12[%c0_22, %c0_23] : memref<8x1xf32, #tpu.memory_space<vmem>>, vector<8x1xf32>
    %c0_24 = arith.constant 0 : index
    %c0_25 = arith.constant 0 : index
    %13 = vector.load %arg13[%c0_24, %c0_25] : memref<32x8xf32, #tpu.memory_space<vmem>>, vector<32x8xf32>
    %c0_26 = arith.constant 0 : index
    %c0_27 = arith.constant 0 : index
    %14 = vector.load %arg14[%c0_26, %c0_27] : memref<32x1xf32, #tpu.memory_space<vmem>>, vector<32x1xf32>
    %cst = arith.constant dense<0.000000e+00> : vector<8x512xf32>
    %15 = tpu.matmul %5, %4, %cst {dimension_numbers = #tpu.dot_dimension_numbers<[1], [0], [0], [1], [0, 0, 1, 1], [], []>} : vector<8x32xf32>, vector<32x512xf32>, vector<8x512xf32> -> vector<8x512xf32>
    %16 = vector.broadcast %6 : vector<8x1xf32> to vector<8x512xf32>
    %17 = arith.addf %15, %16 : vector<8x512xf32>
    %cst_28 = arith.constant 0.000000e+00 : f32
    %18 = vector.broadcast %cst_28 : f32 to vector<8x512xf32>
    %19 = arith.maximumf %17, %18 : vector<8x512xf32>
    %c1_i32 = arith.constant 1 : i32
    %20 = vector.broadcast %c1_i32 : i32 to vector<1x512xi32>
    %21 = arith.cmpi sge, %2, %20 : vector<1x512xi32>
    %22 = arith.extui %21 : vector<1x512xi1> to vector<1x512xi32>
    %23 = arith.sitofp %22 : vector<1x512xi32> to vector<1x512xf32>
    %c7_i32 = arith.constant 7 : i32
    %24 = vector.broadcast %c7_i32 : i32 to vector<1x512xi32>
    %25 = arith.cmpi slt, %2, %24 : vector<1x512xi32>
    %26 = arith.extui %25 : vector<1x512xi1> to vector<1x512xi32>
    %27 = arith.sitofp %26 : vector<1x512xi32> to vector<1x512xf32>
    %cst_29 = arith.constant 0.000000e+00 : f32
    %28 = vector.broadcast %cst_29 : f32 to vector<8x1xf32>
    %29 = vector.extract_strided_slice %19 {offsets = [0, 0], sizes = [8, 511], strides = [1, 1]} : vector<8x512xf32> to vector<8x511xf32>
    %30 = tpu.concatenate %28, %29 in 1 : vector<8x1xf32>, vector<8x511xf32> -> vector<8x512xf32>
    %31 = vector.broadcast %23 : vector<1x512xf32> to vector<8x512xf32>
    %32 = arith.mulf %30, %31 : vector<8x512xf32>
    %cst_30 = arith.constant 0.000000e+00 : f32
    %33 = vector.broadcast %cst_30 : f32 to vector<8x1xf32>
    %34 = vector.extract_strided_slice %19 {offsets = [0, 1], sizes = [8, 511], strides = [1, 1]} : vector<8x512xf32> to vector<8x511xf32>
    %35 = tpu.concatenate %34, %33 in 1 : vector<8x511xf32>, vector<8x1xf32> -> vector<8x512xf32>
    %36 = vector.broadcast %27 : vector<1x512xf32> to vector<8x512xf32>
    %37 = arith.mulf %35, %36 : vector<8x512xf32>
    %38 = tpu.concatenate %32, %19, %37 in 0 : vector<8x512xf32>, vector<8x512xf32>, vector<8x512xf32> -> vector<24x512xf32>
    %cst_31 = arith.constant dense<0.000000e+00> : vector<8x512xf32>
    %39 = tpu.matmul %7, %38, %cst_31 {dimension_numbers = #tpu.dot_dimension_numbers<[1], [0], [0], [1], [0, 0, 1, 1], [], []>} : vector<8x24xf32>, vector<24x512xf32>, vector<8x512xf32> -> vector<8x512xf32>
    %40 = vector.broadcast %8 : vector<8x1xf32> to vector<8x512xf32>
    %41 = arith.addf %39, %40 : vector<8x512xf32>
    %cst_32 = arith.constant 0.000000e+00 : f32
    %42 = vector.broadcast %cst_32 : f32 to vector<8x512xf32>
    %43 = arith.maximumf %41, %42 : vector<8x512xf32>
    %c1_i32_33 = arith.constant 1 : i32
    %44 = vector.broadcast %c1_i32_33 : i32 to vector<1x512xi32>
    %45 = arith.cmpi sge, %1, %44 : vector<1x512xi32>
    %46 = arith.extui %45 : vector<1x512xi1> to vector<1x512xi32>
    %47 = arith.sitofp %46 : vector<1x512xi32> to vector<1x512xf32>
    %c7_i32_34 = arith.constant 7 : i32
    %48 = vector.broadcast %c7_i32_34 : i32 to vector<1x512xi32>
    %49 = arith.cmpi slt, %1, %48 : vector<1x512xi32>
    %50 = arith.extui %49 : vector<1x512xi1> to vector<1x512xi32>
    %51 = arith.sitofp %50 : vector<1x512xi32> to vector<1x512xf32>
    %cst_35 = arith.constant 0.000000e+00 : f32
    %52 = vector.broadcast %cst_35 : f32 to vector<8x8xf32>
    %53 = vector.extract_strided_slice %43 {offsets = [0, 0], sizes = [8, 504], strides = [1, 1]} : vector<8x512xf32> to vector<8x504xf32>
    %54 = tpu.concatenate %52, %53 in 1 : vector<8x8xf32>, vector<8x504xf32> -> vector<8x512xf32>
    %55 = vector.broadcast %47 : vector<1x512xf32> to vector<8x512xf32>
    %56 = arith.mulf %54, %55 : vector<8x512xf32>
    %cst_36 = arith.constant 0.000000e+00 : f32
    %57 = vector.broadcast %cst_36 : f32 to vector<8x8xf32>
    %58 = vector.extract_strided_slice %43 {offsets = [0, 8], sizes = [8, 504], strides = [1, 1]} : vector<8x512xf32> to vector<8x504xf32>
    %59 = tpu.concatenate %58, %57 in 1 : vector<8x504xf32>, vector<8x8xf32> -> vector<8x512xf32>
    %60 = vector.broadcast %51 : vector<1x512xf32> to vector<8x512xf32>
    %61 = arith.mulf %59, %60 : vector<8x512xf32>
    %62 = tpu.concatenate %56, %43, %61 in 0 : vector<8x512xf32>, vector<8x512xf32>, vector<8x512xf32> -> vector<24x512xf32>
    %cst_37 = arith.constant dense<0.000000e+00> : vector<8x512xf32>
    %63 = tpu.matmul %9, %62, %cst_37 {dimension_numbers = #tpu.dot_dimension_numbers<[1], [0], [0], [1], [0, 0, 1, 1], [], []>} : vector<8x24xf32>, vector<24x512xf32>, vector<8x512xf32> -> vector<8x512xf32>
    %64 = vector.broadcast %10 : vector<8x1xf32> to vector<8x512xf32>
    %65 = arith.addf %63, %64 : vector<8x512xf32>
    %66 = arith.addf %65, %41 : vector<8x512xf32>
    %cst_38 = arith.constant 0.000000e+00 : f32
    %67 = vector.broadcast %cst_38 : f32 to vector<8x512xf32>
    %68 = arith.maximumf %66, %67 : vector<8x512xf32>
    %c1_i32_39 = arith.constant 1 : i32
    %69 = vector.broadcast %c1_i32_39 : i32 to vector<1x512xi32>
    %70 = arith.cmpi sge, %0, %69 : vector<1x512xi32>
    %71 = arith.extui %70 : vector<1x512xi1> to vector<1x512xi32>
    %72 = arith.sitofp %71 : vector<1x512xi32> to vector<1x512xf32>
    %c7_i32_40 = arith.constant 7 : i32
    %73 = vector.broadcast %c7_i32_40 : i32 to vector<1x512xi32>
    %74 = arith.cmpi slt, %0, %73 : vector<1x512xi32>
    %75 = arith.extui %74 : vector<1x512xi1> to vector<1x512xi32>
    %76 = arith.sitofp %75 : vector<1x512xi32> to vector<1x512xf32>
    %cst_41 = arith.constant 0.000000e+00 : f32
    %77 = vector.broadcast %cst_41 : f32 to vector<8x64xf32>
    %78 = vector.extract_strided_slice %68 {offsets = [0, 0], sizes = [8, 448], strides = [1, 1]} : vector<8x512xf32> to vector<8x448xf32>
    %79 = tpu.concatenate %77, %78 in 1 : vector<8x64xf32>, vector<8x448xf32> -> vector<8x512xf32>
    %80 = vector.broadcast %72 : vector<1x512xf32> to vector<8x512xf32>
    %81 = arith.mulf %79, %80 : vector<8x512xf32>
    %cst_42 = arith.constant 0.000000e+00 : f32
    %82 = vector.broadcast %cst_42 : f32 to vector<8x64xf32>
    %83 = vector.extract_strided_slice %68 {offsets = [0, 64], sizes = [8, 448], strides = [1, 1]} : vector<8x512xf32> to vector<8x448xf32>
    %84 = tpu.concatenate %83, %82 in 1 : vector<8x448xf32>, vector<8x64xf32> -> vector<8x512xf32>
    %85 = vector.broadcast %76 : vector<1x512xf32> to vector<8x512xf32>
    %86 = arith.mulf %84, %85 : vector<8x512xf32>
    %87 = tpu.concatenate %81, %68, %86 in 0 : vector<8x512xf32>, vector<8x512xf32>, vector<8x512xf32> -> vector<24x512xf32>
    %cst_43 = arith.constant dense<0.000000e+00> : vector<8x512xf32>
    %88 = tpu.matmul %11, %87, %cst_43 {dimension_numbers = #tpu.dot_dimension_numbers<[1], [0], [0], [1], [0, 0, 1, 1], [], []>} : vector<8x24xf32>, vector<24x512xf32>, vector<8x512xf32> -> vector<8x512xf32>
    %89 = vector.broadcast %12 : vector<8x1xf32> to vector<8x512xf32>
    %90 = arith.addf %88, %89 : vector<8x512xf32>
    %91 = arith.addf %90, %41 : vector<8x512xf32>
    %92 = arith.addf %91, %66 : vector<8x512xf32>
    %cst_44 = arith.constant 0.000000e+00 : f32
    %93 = vector.broadcast %cst_44 : f32 to vector<8x512xf32>
    %94 = arith.maximumf %92, %93 : vector<8x512xf32>
    %cst_45 = arith.constant dense<0.000000e+00> : vector<32x512xf32>
    %95 = tpu.matmul %13, %94, %cst_45 {dimension_numbers = #tpu.dot_dimension_numbers<[1], [0], [0], [1], [0, 0, 1, 1], [], []>} : vector<32x8xf32>, vector<8x512xf32>, vector<32x512xf32> -> vector<32x512xf32>
    %96 = vector.broadcast %14 : vector<32x1xf32> to vector<32x512xf32>
    %97 = arith.addf %95, %96 : vector<32x512xf32>
    %98 = arith.addf %97, %4 : vector<32x512xf32>
    %cst_46 = arith.constant 0.000000e+00 : f32
    %99 = vector.broadcast %cst_46 : f32 to vector<32x512xf32>
    %100 = arith.maximumf %98, %99 : vector<32x512xf32>
    %c0_47 = arith.constant 0 : index
    %c0_48 = arith.constant 0 : index
    %101 = vector.load %arg15[%c0_47, %c0_48] : memref<8x32xf32, #tpu.memory_space<vmem>>, vector<8x32xf32>
    %c0_49 = arith.constant 0 : index
    %c0_50 = arith.constant 0 : index
    %102 = vector.load %arg16[%c0_49, %c0_50] : memref<8x1xf32, #tpu.memory_space<vmem>>, vector<8x1xf32>
    %c0_51 = arith.constant 0 : index
    %c0_52 = arith.constant 0 : index
    %103 = vector.load %arg17[%c0_51, %c0_52] : memref<8x24xf32, #tpu.memory_space<vmem>>, vector<8x24xf32>
    %c0_53 = arith.constant 0 : index
    %c0_54 = arith.constant 0 : index
    %104 = vector.load %arg18[%c0_53, %c0_54] : memref<8x1xf32, #tpu.memory_space<vmem>>, vector<8x1xf32>
    %c0_55 = arith.constant 0 : index
    %c0_56 = arith.constant 0 : index
    %105 = vector.load %arg19[%c0_55, %c0_56] : memref<8x24xf32, #tpu.memory_space<vmem>>, vector<8x24xf32>
    %c0_57 = arith.constant 0 : index
    %c0_58 = arith.constant 0 : index
    %106 = vector.load %arg20[%c0_57, %c0_58] : memref<8x1xf32, #tpu.memory_space<vmem>>, vector<8x1xf32>
    %c0_59 = arith.constant 0 : index
    %c0_60 = arith.constant 0 : index
    %107 = vector.load %arg21[%c0_59, %c0_60] : memref<8x24xf32, #tpu.memory_space<vmem>>, vector<8x24xf32>
    %c0_61 = arith.constant 0 : index
    %c0_62 = arith.constant 0 : index
    %108 = vector.load %arg22[%c0_61, %c0_62] : memref<8x1xf32, #tpu.memory_space<vmem>>, vector<8x1xf32>
    %c0_63 = arith.constant 0 : index
    %c0_64 = arith.constant 0 : index
    %109 = vector.load %arg23[%c0_63, %c0_64] : memref<32x8xf32, #tpu.memory_space<vmem>>, vector<32x8xf32>
    %c0_65 = arith.constant 0 : index
    %c0_66 = arith.constant 0 : index
    %110 = vector.load %arg24[%c0_65, %c0_66] : memref<32x1xf32, #tpu.memory_space<vmem>>, vector<32x1xf32>
    %cst_67 = arith.constant dense<0.000000e+00> : vector<8x512xf32>
    %111 = tpu.matmul %101, %100, %cst_67 {dimension_numbers = #tpu.dot_dimension_numbers<[1], [0], [0], [1], [0, 0, 1, 1], [], []>} : vector<8x32xf32>, vector<32x512xf32>, vector<8x512xf32> -> vector<8x512xf32>
    %112 = vector.broadcast %102 : vector<8x1xf32> to vector<8x512xf32>
    %113 = arith.addf %111, %112 : vector<8x512xf32>
    %cst_68 = arith.constant 0.000000e+00 : f32
    %114 = vector.broadcast %cst_68 : f32 to vector<8x512xf32>
    %115 = arith.maximumf %113, %114 : vector<8x512xf32>
    %c2_i32 = arith.constant 2 : i32
    %116 = vector.broadcast %c2_i32 : i32 to vector<1x512xi32>
    %117 = arith.cmpi sge, %2, %116 : vector<1x512xi32>
    %118 = arith.extui %117 : vector<1x512xi1> to vector<1x512xi32>
    %119 = arith.sitofp %118 : vector<1x512xi32> to vector<1x512xf32>
    %c6_i32 = arith.constant 6 : i32
    %120 = vector.broadcast %c6_i32 : i32 to vector<1x512xi32>
    %121 = arith.cmpi slt, %2, %120 : vector<1x512xi32>
    %122 = arith.extui %121 : vector<1x512xi1> to vector<1x512xi32>
    %123 = arith.sitofp %122 : vector<1x512xi32> to vector<1x512xf32>
    %cst_69 = arith.constant 0.000000e+00 : f32
    %124 = vector.broadcast %cst_69 : f32 to vector<8x2xf32>
    %125 = vector.extract_strided_slice %115 {offsets = [0, 0], sizes = [8, 510], strides = [1, 1]} : vector<8x512xf32> to vector<8x510xf32>
    %126 = tpu.concatenate %124, %125 in 1 : vector<8x2xf32>, vector<8x510xf32> -> vector<8x512xf32>
    %127 = vector.broadcast %119 : vector<1x512xf32> to vector<8x512xf32>
    %128 = arith.mulf %126, %127 : vector<8x512xf32>
    %cst_70 = arith.constant 0.000000e+00 : f32
    %129 = vector.broadcast %cst_70 : f32 to vector<8x2xf32>
    %130 = vector.extract_strided_slice %115 {offsets = [0, 2], sizes = [8, 510], strides = [1, 1]} : vector<8x512xf32> to vector<8x510xf32>
    %131 = tpu.concatenate %130, %129 in 1 : vector<8x510xf32>, vector<8x2xf32> -> vector<8x512xf32>
    %132 = vector.broadcast %123 : vector<1x512xf32> to vector<8x512xf32>
    %133 = arith.mulf %131, %132 : vector<8x512xf32>
    %134 = tpu.concatenate %128, %115, %133 in 0 : vector<8x512xf32>, vector<8x512xf32>, vector<8x512xf32> -> vector<24x512xf32>
    %cst_71 = arith.constant dense<0.000000e+00> : vector<8x512xf32>
    %135 = tpu.matmul %103, %134, %cst_71 {dimension_numbers = #tpu.dot_dimension_numbers<[1], [0], [0], [1], [0, 0, 1, 1], [], []>} : vector<8x24xf32>, vector<24x512xf32>, vector<8x512xf32> -> vector<8x512xf32>
    %136 = vector.broadcast %104 : vector<8x1xf32> to vector<8x512xf32>
    %137 = arith.addf %135, %136 : vector<8x512xf32>
    %cst_72 = arith.constant 0.000000e+00 : f32
    %138 = vector.broadcast %cst_72 : f32 to vector<8x512xf32>
    %139 = arith.maximumf %137, %138 : vector<8x512xf32>
    %c2_i32_73 = arith.constant 2 : i32
    %140 = vector.broadcast %c2_i32_73 : i32 to vector<1x512xi32>
    %141 = arith.cmpi sge, %1, %140 : vector<1x512xi32>
    %142 = arith.extui %141 : vector<1x512xi1> to vector<1x512xi32>
    %143 = arith.sitofp %142 : vector<1x512xi32> to vector<1x512xf32>
    %c6_i32_74 = arith.constant 6 : i32
    %144 = vector.broadcast %c6_i32_74 : i32 to vector<1x512xi32>
    %145 = arith.cmpi slt, %1, %144 : vector<1x512xi32>
    %146 = arith.extui %145 : vector<1x512xi1> to vector<1x512xi32>
    %147 = arith.sitofp %146 : vector<1x512xi32> to vector<1x512xf32>
    %cst_75 = arith.constant 0.000000e+00 : f32
    %148 = vector.broadcast %cst_75 : f32 to vector<8x16xf32>
    %149 = vector.extract_strided_slice %139 {offsets = [0, 0], sizes = [8, 496], strides = [1, 1]} : vector<8x512xf32> to vector<8x496xf32>
    %150 = tpu.concatenate %148, %149 in 1 : vector<8x16xf32>, vector<8x496xf32> -> vector<8x512xf32>
    %151 = vector.broadcast %143 : vector<1x512xf32> to vector<8x512xf32>
    %152 = arith.mulf %150, %151 : vector<8x512xf32>
    %cst_76 = arith.constant 0.000000e+00 : f32
    %153 = vector.broadcast %cst_76 : f32 to vector<8x16xf32>
    %154 = vector.extract_strided_slice %139 {offsets = [0, 16], sizes = [8, 496], strides = [1, 1]} : vector<8x512xf32> to vector<8x496xf32>
    %155 = tpu.concatenate %154, %153 in 1 : vector<8x496xf32>, vector<8x16xf32> -> vector<8x512xf32>
    %156 = vector.broadcast %147 : vector<1x512xf32> to vector<8x512xf32>
    %157 = arith.mulf %155, %156 : vector<8x512xf32>
    %158 = tpu.concatenate %152, %139, %157 in 0 : vector<8x512xf32>, vector<8x512xf32>, vector<8x512xf32> -> vector<24x512xf32>
    %cst_77 = arith.constant dense<0.000000e+00> : vector<8x512xf32>
    %159 = tpu.matmul %105, %158, %cst_77 {dimension_numbers = #tpu.dot_dimension_numbers<[1], [0], [0], [1], [0, 0, 1, 1], [], []>} : vector<8x24xf32>, vector<24x512xf32>, vector<8x512xf32> -> vector<8x512xf32>
    %160 = vector.broadcast %106 : vector<8x1xf32> to vector<8x512xf32>
    %161 = arith.addf %159, %160 : vector<8x512xf32>
    %162 = arith.addf %161, %137 : vector<8x512xf32>
    %cst_78 = arith.constant 0.000000e+00 : f32
    %163 = vector.broadcast %cst_78 : f32 to vector<8x512xf32>
    %164 = arith.maximumf %162, %163 : vector<8x512xf32>
    %c2_i32_79 = arith.constant 2 : i32
    %165 = vector.broadcast %c2_i32_79 : i32 to vector<1x512xi32>
    %166 = arith.cmpi sge, %0, %165 : vector<1x512xi32>
    %167 = arith.extui %166 : vector<1x512xi1> to vector<1x512xi32>
    %168 = arith.sitofp %167 : vector<1x512xi32> to vector<1x512xf32>
    %c6_i32_80 = arith.constant 6 : i32
    %169 = vector.broadcast %c6_i32_80 : i32 to vector<1x512xi32>
    %170 = arith.cmpi slt, %0, %169 : vector<1x512xi32>
    %171 = arith.extui %170 : vector<1x512xi1> to vector<1x512xi32>
    %172 = arith.sitofp %171 : vector<1x512xi32> to vector<1x512xf32>
    %cst_81 = arith.constant 0.000000e+00 : f32
    %173 = vector.broadcast %cst_81 : f32 to vector<8x128xf32>
    %174 = vector.extract_strided_slice %164 {offsets = [0, 0], sizes = [8, 384], strides = [1, 1]} : vector<8x512xf32> to vector<8x384xf32>
    %175 = tpu.concatenate %173, %174 in 1 : vector<8x128xf32>, vector<8x384xf32> -> vector<8x512xf32>
    %176 = vector.broadcast %168 : vector<1x512xf32> to vector<8x512xf32>
    %177 = arith.mulf %175, %176 : vector<8x512xf32>
    %cst_82 = arith.constant 0.000000e+00 : f32
    %178 = vector.broadcast %cst_82 : f32 to vector<8x128xf32>
    %179 = vector.extract_strided_slice %164 {offsets = [0, 128], sizes = [8, 384], strides = [1, 1]} : vector<8x512xf32> to vector<8x384xf32>
    %180 = tpu.concatenate %179, %178 in 1 : vector<8x384xf32>, vector<8x128xf32> -> vector<8x512xf32>
    %181 = vector.broadcast %172 : vector<1x512xf32> to vector<8x512xf32>
    %182 = arith.mulf %180, %181 : vector<8x512xf32>
    %183 = tpu.concatenate %177, %164, %182 in 0 : vector<8x512xf32>, vector<8x512xf32>, vector<8x512xf32> -> vector<24x512xf32>
    %cst_83 = arith.constant dense<0.000000e+00> : vector<8x512xf32>
    %184 = tpu.matmul %107, %183, %cst_83 {dimension_numbers = #tpu.dot_dimension_numbers<[1], [0], [0], [1], [0, 0, 1, 1], [], []>} : vector<8x24xf32>, vector<24x512xf32>, vector<8x512xf32> -> vector<8x512xf32>
    %185 = vector.broadcast %108 : vector<8x1xf32> to vector<8x512xf32>
    %186 = arith.addf %184, %185 : vector<8x512xf32>
    %187 = arith.addf %186, %137 : vector<8x512xf32>
    %188 = arith.addf %187, %162 : vector<8x512xf32>
    %cst_84 = arith.constant 0.000000e+00 : f32
    %189 = vector.broadcast %cst_84 : f32 to vector<8x512xf32>
    %190 = arith.maximumf %188, %189 : vector<8x512xf32>
    %cst_85 = arith.constant dense<0.000000e+00> : vector<32x512xf32>
    %191 = tpu.matmul %109, %190, %cst_85 {dimension_numbers = #tpu.dot_dimension_numbers<[1], [0], [0], [1], [0, 0, 1, 1], [], []>} : vector<32x8xf32>, vector<8x512xf32>, vector<32x512xf32> -> vector<32x512xf32>
    %192 = vector.broadcast %110 : vector<32x1xf32> to vector<32x512xf32>
    %193 = arith.addf %191, %192 : vector<32x512xf32>
    %194 = arith.addf %193, %100 : vector<32x512xf32>
    %cst_86 = arith.constant 0.000000e+00 : f32
    %195 = vector.broadcast %cst_86 : f32 to vector<32x512xf32>
    %196 = arith.maximumf %194, %195 : vector<32x512xf32>
    %c0_87 = arith.constant 0 : index
    %c0_88 = arith.constant 0 : index
    %197 = vector.load %arg25[%c0_87, %c0_88] : memref<8x32xf32, #tpu.memory_space<vmem>>, vector<8x32xf32>
    %c0_89 = arith.constant 0 : index
    %c0_90 = arith.constant 0 : index
    %198 = vector.load %arg26[%c0_89, %c0_90] : memref<8x1xf32, #tpu.memory_space<vmem>>, vector<8x1xf32>
    %c0_91 = arith.constant 0 : index
    %c0_92 = arith.constant 0 : index
    %199 = vector.load %arg27[%c0_91, %c0_92] : memref<8x24xf32, #tpu.memory_space<vmem>>, vector<8x24xf32>
    %c0_93 = arith.constant 0 : index
    %c0_94 = arith.constant 0 : index
    %200 = vector.load %arg28[%c0_93, %c0_94] : memref<8x1xf32, #tpu.memory_space<vmem>>, vector<8x1xf32>
    %c0_95 = arith.constant 0 : index
    %c0_96 = arith.constant 0 : index
    %201 = vector.load %arg29[%c0_95, %c0_96] : memref<8x24xf32, #tpu.memory_space<vmem>>, vector<8x24xf32>
    %c0_97 = arith.constant 0 : index
    %c0_98 = arith.constant 0 : index
    %202 = vector.load %arg30[%c0_97, %c0_98] : memref<8x1xf32, #tpu.memory_space<vmem>>, vector<8x1xf32>
    %c0_99 = arith.constant 0 : index
    %c0_100 = arith.constant 0 : index
    %203 = vector.load %arg31[%c0_99, %c0_100] : memref<8x24xf32, #tpu.memory_space<vmem>>, vector<8x24xf32>
    %c0_101 = arith.constant 0 : index
    %c0_102 = arith.constant 0 : index
    %204 = vector.load %arg32[%c0_101, %c0_102] : memref<8x1xf32, #tpu.memory_space<vmem>>, vector<8x1xf32>
    %c0_103 = arith.constant 0 : index
    %c0_104 = arith.constant 0 : index
    %205 = vector.load %arg33[%c0_103, %c0_104] : memref<32x8xf32, #tpu.memory_space<vmem>>, vector<32x8xf32>
    %c0_105 = arith.constant 0 : index
    %c0_106 = arith.constant 0 : index
    %206 = vector.load %arg34[%c0_105, %c0_106] : memref<32x1xf32, #tpu.memory_space<vmem>>, vector<32x1xf32>
    %cst_107 = arith.constant dense<0.000000e+00> : vector<8x512xf32>
    %207 = tpu.matmul %197, %196, %cst_107 {dimension_numbers = #tpu.dot_dimension_numbers<[1], [0], [0], [1], [0, 0, 1, 1], [], []>} : vector<8x32xf32>, vector<32x512xf32>, vector<8x512xf32> -> vector<8x512xf32>
    %208 = vector.broadcast %198 : vector<8x1xf32> to vector<8x512xf32>
    %209 = arith.addf %207, %208 : vector<8x512xf32>
    %cst_108 = arith.constant 0.000000e+00 : f32
    %210 = vector.broadcast %cst_108 : f32 to vector<8x512xf32>
    %211 = arith.maximumf %209, %210 : vector<8x512xf32>
    %c3_i32 = arith.constant 3 : i32
    %212 = vector.broadcast %c3_i32 : i32 to vector<1x512xi32>
    %213 = arith.cmpi sge, %2, %212 : vector<1x512xi32>
    %214 = arith.extui %213 : vector<1x512xi1> to vector<1x512xi32>
    %215 = arith.sitofp %214 : vector<1x512xi32> to vector<1x512xf32>
    %c5_i32 = arith.constant 5 : i32
    %216 = vector.broadcast %c5_i32 : i32 to vector<1x512xi32>
    %217 = arith.cmpi slt, %2, %216 : vector<1x512xi32>
    %218 = arith.extui %217 : vector<1x512xi1> to vector<1x512xi32>
    %219 = arith.sitofp %218 : vector<1x512xi32> to vector<1x512xf32>
    %cst_109 = arith.constant 0.000000e+00 : f32
    %220 = vector.broadcast %cst_109 : f32 to vector<8x3xf32>
    %221 = vector.extract_strided_slice %211 {offsets = [0, 0], sizes = [8, 509], strides = [1, 1]} : vector<8x512xf32> to vector<8x509xf32>
    %222 = tpu.concatenate %220, %221 in 1 : vector<8x3xf32>, vector<8x509xf32> -> vector<8x512xf32>
    %223 = vector.broadcast %215 : vector<1x512xf32> to vector<8x512xf32>
    %224 = arith.mulf %222, %223 : vector<8x512xf32>
    %cst_110 = arith.constant 0.000000e+00 : f32
    %225 = vector.broadcast %cst_110 : f32 to vector<8x3xf32>
    %226 = vector.extract_strided_slice %211 {offsets = [0, 3], sizes = [8, 509], strides = [1, 1]} : vector<8x512xf32> to vector<8x509xf32>
    %227 = tpu.concatenate %226, %225 in 1 : vector<8x509xf32>, vector<8x3xf32> -> vector<8x512xf32>
    %228 = vector.broadcast %219 : vector<1x512xf32> to vector<8x512xf32>
    %229 = arith.mulf %227, %228 : vector<8x512xf32>
    %230 = tpu.concatenate %224, %211, %229 in 0 : vector<8x512xf32>, vector<8x512xf32>, vector<8x512xf32> -> vector<24x512xf32>
    %cst_111 = arith.constant dense<0.000000e+00> : vector<8x512xf32>
    %231 = tpu.matmul %199, %230, %cst_111 {dimension_numbers = #tpu.dot_dimension_numbers<[1], [0], [0], [1], [0, 0, 1, 1], [], []>} : vector<8x24xf32>, vector<24x512xf32>, vector<8x512xf32> -> vector<8x512xf32>
    %232 = vector.broadcast %200 : vector<8x1xf32> to vector<8x512xf32>
    %233 = arith.addf %231, %232 : vector<8x512xf32>
    %cst_112 = arith.constant 0.000000e+00 : f32
    %234 = vector.broadcast %cst_112 : f32 to vector<8x512xf32>
    %235 = arith.maximumf %233, %234 : vector<8x512xf32>
    %c3_i32_113 = arith.constant 3 : i32
    %236 = vector.broadcast %c3_i32_113 : i32 to vector<1x512xi32>
    %237 = arith.cmpi sge, %1, %236 : vector<1x512xi32>
    %238 = arith.extui %237 : vector<1x512xi1> to vector<1x512xi32>
    %239 = arith.sitofp %238 : vector<1x512xi32> to vector<1x512xf32>
    %c5_i32_114 = arith.constant 5 : i32
    %240 = vector.broadcast %c5_i32_114 : i32 to vector<1x512xi32>
    %241 = arith.cmpi slt, %1, %240 : vector<1x512xi32>
    %242 = arith.extui %241 : vector<1x512xi1> to vector<1x512xi32>
    %243 = arith.sitofp %242 : vector<1x512xi32> to vector<1x512xf32>
    %cst_115 = arith.constant 0.000000e+00 : f32
    %244 = vector.broadcast %cst_115 : f32 to vector<8x24xf32>
    %245 = vector.extract_strided_slice %235 {offsets = [0, 0], sizes = [8, 488], strides = [1, 1]} : vector<8x512xf32> to vector<8x488xf32>
    %246 = tpu.concatenate %244, %245 in 1 : vector<8x24xf32>, vector<8x488xf32> -> vector<8x512xf32>
    %247 = vector.broadcast %239 : vector<1x512xf32> to vector<8x512xf32>
    %248 = arith.mulf %246, %247 : vector<8x512xf32>
    %cst_116 = arith.constant 0.000000e+00 : f32
    %249 = vector.broadcast %cst_116 : f32 to vector<8x24xf32>
    %250 = vector.extract_strided_slice %235 {offsets = [0, 24], sizes = [8, 488], strides = [1, 1]} : vector<8x512xf32> to vector<8x488xf32>
    %251 = tpu.concatenate %250, %249 in 1 : vector<8x488xf32>, vector<8x24xf32> -> vector<8x512xf32>
    %252 = vector.broadcast %243 : vector<1x512xf32> to vector<8x512xf32>
    %253 = arith.mulf %251, %252 : vector<8x512xf32>
    %254 = tpu.concatenate %248, %235, %253 in 0 : vector<8x512xf32>, vector<8x512xf32>, vector<8x512xf32> -> vector<24x512xf32>
    %cst_117 = arith.constant dense<0.000000e+00> : vector<8x512xf32>
    %255 = tpu.matmul %201, %254, %cst_117 {dimension_numbers = #tpu.dot_dimension_numbers<[1], [0], [0], [1], [0, 0, 1, 1], [], []>} : vector<8x24xf32>, vector<24x512xf32>, vector<8x512xf32> -> vector<8x512xf32>
    %256 = vector.broadcast %202 : vector<8x1xf32> to vector<8x512xf32>
    %257 = arith.addf %255, %256 : vector<8x512xf32>
    %258 = arith.addf %257, %233 : vector<8x512xf32>
    %cst_118 = arith.constant 0.000000e+00 : f32
    %259 = vector.broadcast %cst_118 : f32 to vector<8x512xf32>
    %260 = arith.maximumf %258, %259 : vector<8x512xf32>
    %c3_i32_119 = arith.constant 3 : i32
    %261 = vector.broadcast %c3_i32_119 : i32 to vector<1x512xi32>
    %262 = arith.cmpi sge, %0, %261 : vector<1x512xi32>
    %263 = arith.extui %262 : vector<1x512xi1> to vector<1x512xi32>
    %264 = arith.sitofp %263 : vector<1x512xi32> to vector<1x512xf32>
    %c5_i32_120 = arith.constant 5 : i32
    %265 = vector.broadcast %c5_i32_120 : i32 to vector<1x512xi32>
    %266 = arith.cmpi slt, %0, %265 : vector<1x512xi32>
    %267 = arith.extui %266 : vector<1x512xi1> to vector<1x512xi32>
    %268 = arith.sitofp %267 : vector<1x512xi32> to vector<1x512xf32>
    %cst_121 = arith.constant 0.000000e+00 : f32
    %269 = vector.broadcast %cst_121 : f32 to vector<8x192xf32>
    %270 = vector.extract_strided_slice %260 {offsets = [0, 0], sizes = [8, 320], strides = [1, 1]} : vector<8x512xf32> to vector<8x320xf32>
    %271 = tpu.concatenate %269, %270 in 1 : vector<8x192xf32>, vector<8x320xf32> -> vector<8x512xf32>
    %272 = vector.broadcast %264 : vector<1x512xf32> to vector<8x512xf32>
    %273 = arith.mulf %271, %272 : vector<8x512xf32>
    %cst_122 = arith.constant 0.000000e+00 : f32
    %274 = vector.broadcast %cst_122 : f32 to vector<8x192xf32>
    %275 = vector.extract_strided_slice %260 {offsets = [0, 192], sizes = [8, 320], strides = [1, 1]} : vector<8x512xf32> to vector<8x320xf32>
    %276 = tpu.concatenate %275, %274 in 1 : vector<8x320xf32>, vector<8x192xf32> -> vector<8x512xf32>
    %277 = vector.broadcast %268 : vector<1x512xf32> to vector<8x512xf32>
    %278 = arith.mulf %276, %277 : vector<8x512xf32>
    %279 = tpu.concatenate %273, %260, %278 in 0 : vector<8x512xf32>, vector<8x512xf32>, vector<8x512xf32> -> vector<24x512xf32>
    %cst_123 = arith.constant dense<0.000000e+00> : vector<8x512xf32>
    %280 = tpu.matmul %203, %279, %cst_123 {dimension_numbers = #tpu.dot_dimension_numbers<[1], [0], [0], [1], [0, 0, 1, 1], [], []>} : vector<8x24xf32>, vector<24x512xf32>, vector<8x512xf32> -> vector<8x512xf32>
    %281 = vector.broadcast %204 : vector<8x1xf32> to vector<8x512xf32>
    %282 = arith.addf %280, %281 : vector<8x512xf32>
    %283 = arith.addf %282, %233 : vector<8x512xf32>
    %284 = arith.addf %283, %258 : vector<8x512xf32>
    %cst_124 = arith.constant 0.000000e+00 : f32
    %285 = vector.broadcast %cst_124 : f32 to vector<8x512xf32>
    %286 = arith.maximumf %284, %285 : vector<8x512xf32>
    %cst_125 = arith.constant dense<0.000000e+00> : vector<32x512xf32>
    %287 = tpu.matmul %205, %286, %cst_125 {dimension_numbers = #tpu.dot_dimension_numbers<[1], [0], [0], [1], [0, 0, 1, 1], [], []>} : vector<32x8xf32>, vector<8x512xf32>, vector<32x512xf32> -> vector<32x512xf32>
    %288 = vector.broadcast %206 : vector<32x1xf32> to vector<32x512xf32>
    %289 = arith.addf %287, %288 : vector<32x512xf32>
    %290 = arith.addf %289, %196 : vector<32x512xf32>
    %cst_126 = arith.constant 0.000000e+00 : f32
    %291 = vector.broadcast %cst_126 : f32 to vector<32x512xf32>
    %292 = arith.maximumf %290, %291 : vector<32x512xf32>
    %c0_127 = arith.constant 0 : index
    %c0_128 = arith.constant 0 : index
    %c0_129 = arith.constant 0 : index
    %293 = vector.load %arg35[%c0_127, %c0_128, %c0_129] : memref<1x32x512xf32, #tpu.memory_space<vmem>>, vector<1x32x512xf32>
    %294 = vector.shape_cast %293 : vector<1x32x512xf32> to vector<32x512xf32>
    %295 = vector.shape_cast %292 : vector<32x512xf32> to vector<1x32x512xf32>
    tpu.vector_store %arg35[%c0_127, %c0_128, %c0_129], %295 {strides = array<i32>} : memref<1x32x512xf32, #tpu.memory_space<vmem>>, vector<1x32x512xf32>,
    return
  }
  func.func @transform_0(%arg0: i32) -> (i32, i32, i32) {
    %c0_i32 = arith.constant 0 : i32
    %c0_i32_0 = arith.constant 0 : i32
    %c0_i32_1 = arith.constant 0 : i32
    return %arg0, %c0_i32, %c0_i32_0 : i32, i32, i32
  }
  func.func @transform_1(%arg0: i32) -> (i32, i32) {
    %c0_i32 = arith.constant 0 : i32
    %c0_i32_0 = arith.constant 0 : i32
    %c0_i32_1 = arith.constant 0 : i32
    return %c0_i32, %c0_i32_0 : i32, i32
  }
  func.func @transform_2(%arg0: i32) -> (i32, i32) {
    %c0_i32 = arith.constant 0 : i32
    %c0_i32_0 = arith.constant 0 : i32
    %c0_i32_1 = arith.constant 0 : i32
    return %c0_i32, %c0_i32_0 : i32, i32
  }
  func.func @transform_3(%arg0: i32) -> (i32, i32) {
    %c0_i32 = arith.constant 0 : i32
    %c0_i32_0 = arith.constant 0 : i32
    %c0_i32_1 = arith.constant 0 : i32
    return %c0_i32, %c0_i32_0 : i32, i32
  }
  func.func @transform_4(%arg0: i32) -> (i32, i32) {
    %c0_i32 = arith.constant 0 : i32
    %c0_i32_0 = arith.constant 0 : i32
    %c0_i32_1 = arith.constant 0 : i32
    return %c0_i32, %c0_i32_0 : i32, i32
  }
  func.func @transform_5(%arg0: i32) -> (i32, i32) {
    %c0_i32 = arith.constant 0 : i32
    %c0_i32_0 = arith.constant 0 : i32
    %c0_i32_1 = arith.constant 0 : i32
    return %c0_i32, %c0_i32_0 : i32, i32
  }
  func.func @transform_6(%arg0: i32) -> (i32, i32) {
    %c0_i32 = arith.constant 0 : i32
    %c0_i32_0 = arith.constant 0 : i32
    %c0_i32_1 = arith.constant 0 : i32
    return %c0_i32, %c0_i32_0 : i32, i32
  }
  func.func @transform_7(%arg0: i32) -> (i32, i32) {
    %c0_i32 = arith.constant 0 : i32
    %c0_i32_0 = arith.constant 0 : i32
    %c0_i32_1 = arith.constant 0 : i32
    return %c0_i32, %c0_i32_0 : i32, i32
  }
  func.func @transform_8(%arg0: i32) -> (i32, i32) {
    %c0_i32 = arith.constant 0 : i32
    %c0_i32_0 = arith.constant 0 : i32
    %c0_i32_1 = arith.constant 0 : i32
    return %c0_i32, %c0_i32_0 : i32, i32
  }
  func.func @transform_9(%arg0: i32) -> (i32, i32) {
    %c0_i32 = arith.constant 0 : i32
    %c0_i32_0 = arith.constant 0 : i32
    %c0_i32_1 = arith.constant 0 : i32
    return %c0_i32, %c0_i32_0 : i32, i32
  }
  func.func @transform_10(%arg0: i32) -> (i32, i32) {
    %c0_i32 = arith.constant 0 : i32
    %c0_i32_0 = arith.constant 0 : i32
    %c0_i32_1 = arith.constant 0 : i32
    return %c0_i32, %c0_i32_0 : i32, i32
  }
  func.func @transform_11(%arg0: i32) -> (i32, i32) {
    %c0_i32 = arith.constant 0 : i32
    %c0_i32_0 = arith.constant 0 : i32
    %c0_i32_1 = arith.constant 0 : i32
    return %c0_i32, %c0_i32_0 : i32, i32
  }
  func.func @transform_12(%arg0: i32) -> (i32, i32) {
    %c0_i32 = arith.constant 0 : i32
    %c0_i32_0 = arith.constant 0 : i32
    %c0_i32_1 = arith.constant 0 : i32
    return %c0_i32, %c0_i32_0 : i32, i32
  }
  func.func @transform_13(%arg0: i32) -> (i32, i32) {
    %c0_i32 = arith.constant 0 : i32
    %c0_i32_0 = arith.constant 0 : i32
    %c0_i32_1 = arith.constant 0 : i32
    return %c0_i32, %c0_i32_0 : i32, i32
  }
  func.func @transform_14(%arg0: i32) -> (i32, i32) {
    %c0_i32 = arith.constant 0 : i32
    %c0_i32_0 = arith.constant 0 : i32
    %c0_i32_1 = arith.constant 0 : i32
    return %c0_i32, %c0_i32_0 : i32, i32
  }
  func.func @transform_15(%arg0: i32) -> (i32, i32) {
    %c0_i32 = arith.constant 0 : i32
    %c0_i32_0 = arith.constant 0 : i32
    %c0_i32_1 = arith.constant 0 : i32
    return %c0_i32, %c0_i32_0 : i32, i32
  }
  func.func @transform_16(%arg0: i32) -> (i32, i32) {
    %c0_i32 = arith.constant 0 : i32
    %c0_i32_0 = arith.constant 0 : i32
    %c0_i32_1 = arith.constant 0 : i32
    return %c0_i32, %c0_i32_0 : i32, i32
  }
  func.func @transform_17(%arg0: i32) -> (i32, i32) {
    %c0_i32 = arith.constant 0 : i32
    %c0_i32_0 = arith.constant 0 : i32
    %c0_i32_1 = arith.constant 0 : i32
    return %c0_i32, %c0_i32_0 : i32, i32
  }
  func.func @transform_18(%arg0: i32) -> (i32, i32) {
    %c0_i32 = arith.constant 0 : i32
    %c0_i32_0 = arith.constant 0 : i32
    %c0_i32_1 = arith.constant 0 : i32
    return %c0_i32, %c0_i32_0 : i32, i32
  }
  func.func @transform_19(%arg0: i32) -> (i32, i32) {
    %c0_i32 = arith.constant 0 : i32
    %c0_i32_0 = arith.constant 0 : i32
    %c0_i32_1 = arith.constant 0 : i32
    return %c0_i32, %c0_i32_0 : i32, i32
  }
  func.func @transform_20(%arg0: i32) -> (i32, i32) {
    %c0_i32 = arith.constant 0 : i32
    %c0_i32_0 = arith.constant 0 : i32
    %c0_i32_1 = arith.constant 0 : i32
    return %c0_i32, %c0_i32_0 : i32, i32
  }
  func.func @transform_21(%arg0: i32) -> (i32, i32) {
    %c0_i32 = arith.constant 0 : i32
    %c0_i32_0 = arith.constant 0 : i32
    %c0_i32_1 = arith.constant 0 : i32
    return %c0_i32, %c0_i32_0 : i32, i32
  }
  func.func @transform_22(%arg0: i32) -> (i32, i32) {
    %c0_i32 = arith.constant 0 : i32
    %c0_i32_0 = arith.constant 0 : i32
    %c0_i32_1 = arith.constant 0 : i32
    return %c0_i32, %c0_i32_0 : i32, i32
  }
  func.func @transform_23(%arg0: i32) -> (i32, i32) {
    %c0_i32 = arith.constant 0 : i32
    %c0_i32_0 = arith.constant 0 : i32
    %c0_i32_1 = arith.constant 0 : i32
    return %c0_i32, %c0_i32_0 : i32, i32
  }
  func.func @transform_24(%arg0: i32) -> (i32, i32) {
    %c0_i32 = arith.constant 0 : i32
    %c0_i32_0 = arith.constant 0 : i32
    %c0_i32_1 = arith.constant 0 : i32
    return %c0_i32, %c0_i32_0 : i32, i32
  }
  func.func @transform_25(%arg0: i32) -> (i32, i32) {
    %c0_i32 = arith.constant 0 : i32
    %c0_i32_0 = arith.constant 0 : i32
    %c0_i32_1 = arith.constant 0 : i32
    return %c0_i32, %c0_i32_0 : i32, i32
  }
  func.func @transform_26(%arg0: i32) -> (i32, i32) {
    %c0_i32 = arith.constant 0 : i32
    %c0_i32_0 = arith.constant 0 : i32
    %c0_i32_1 = arith.constant 0 : i32
    return %c0_i32, %c0_i32_0 : i32, i32
  }
  func.func @transform_27(%arg0: i32) -> (i32, i32) {
    %c0_i32 = arith.constant 0 : i32
    %c0_i32_0 = arith.constant 0 : i32
    %c0_i32_1 = arith.constant 0 : i32
    return %c0_i32, %c0_i32_0 : i32, i32
  }
  func.func @transform_28(%arg0: i32) -> (i32, i32) {
    %c0_i32 = arith.constant 0 : i32
    %c0_i32_0 = arith.constant 0 : i32
    %c0_i32_1 = arith.constant 0 : i32
    return %c0_i32, %c0_i32_0 : i32, i32
  }
  func.func @transform_29(%arg0: i32) -> (i32, i32) {
    %c0_i32 = arith.constant 0 : i32
    %c0_i32_0 = arith.constant 0 : i32
    %c0_i32_1 = arith.constant 0 : i32
    return %c0_i32, %c0_i32_0 : i32, i32
  }
  func.func @transform_30(%arg0: i32) -> (i32, i32) {
    %c0_i32 = arith.constant 0 : i32
    %c0_i32_0 = arith.constant 0 : i32
    %c0_i32_1 = arith.constant 0 : i32
    return %c0_i32, %c0_i32_0 : i32, i32
  }
  func.func @transform_31(%arg0: i32) -> (i32, i32) {
    %c0_i32 = arith.constant 0 : i32
    %c0_i32_0 = arith.constant 0 : i32
    %c0_i32_1 = arith.constant 0 : i32
    return %c0_i32, %c0_i32_0 : i32, i32
  }
  func.func @transform_32(%arg0: i32) -> (i32, i32) {
    %c0_i32 = arith.constant 0 : i32
    %c0_i32_0 = arith.constant 0 : i32
    %c0_i32_1 = arith.constant 0 : i32
    return %c0_i32, %c0_i32_0 : i32, i32
  }
  func.func @transform_33(%arg0: i32) -> (i32, i32) {
    %c0_i32 = arith.constant 0 : i32
    %c0_i32_0 = arith.constant 0 : i32
    %c0_i32_1 = arith.constant 0 : i32
    return %c0_i32, %c0_i32_0 : i32, i32
  }
  func.func @transform_34(%arg0: i32) -> (i32, i32, i32) {
    %c0_i32 = arith.constant 0 : i32
    %c0_i32_0 = arith.constant 0 : i32
    %c0_i32_1 = arith.constant 0 : i32
    return %arg0, %c0_i32, %c0_i32_0 : i32, i32, i32
  }
}

</mosaic_0001>

<bundles_post_ra>
// kernel: process_kitti.1
= control target key start
LH: loop header
LB: loop body
LE: loop exit
PB: predicated region body
PF: predicated region fallthrough
CT: control target
= control target key end

     0   :  { %s4872_s6 = smov 1   ;;  %s4873_s10 = smov 2   ;;  %s5847_s0 = inlined_call_operand.smem [shape: u32[35], index: -1, kind: input, shape index: {}] }
   0x1   :  { %s4929_s5 = sld [smem:[%s5847_s0]]   ;;  %s4874_s14 = smov 3  }
   0x2   :  { %s4934_s9 = sld [smem:[%s5847_s0 + %s4872_s6]]   ;;  %s4875_s18 = smov 4  }
   0x3   :  { %s4939_s13 = sld [smem:[%s5847_s0 + %s4873_s10]]   ;;  %s4876_s22 = smov 5  }
   0x4   :  { %s4944_s17 = sld [smem:[%s5847_s0 + %s4874_s14]]   ;;  %s4877_s26 = smov 6  }
   0x5   :  { %s4949_s21 = sld [smem:[%s5847_s0 + %s4875_s18]]   ;;  %s4878_s30 = smov 7  }
   0x6   :  { %s4954_s25 = sld [smem:[%s5847_s0 + %s4876_s22]]   ;;  %s4879_s4 = smov 8  }
   0x7   :  { %s4959_s29 = sld [smem:[%s5847_s0 + %s4877_s26]]   ;;  %s4880_s10 = smov 9  }
   0x8   :  { %s4964_s3 = sld [smem:[%s5847_s0 + %s4878_s30]]   ;;  %s4881_s15 = smov 10  }
   0x9   :  { %s4969_s8 = sld [smem:[%s5847_s0 + %s4879_s4]]   ;;  %s4882_s20 = smov 11  }
   0xa   :  { %s4974_s14 = sld [smem:[%s5847_s0 + %s4880_s10]]   ;;  %s4883_s26 = smov 12  }
   0xb   :  { %s4979_s19 = sld [smem:[%s5847_s0 + %s4881_s15]]   ;;  %s4884_s1 = smov 13  }
   0xc   :  { %s4984_s24 = sld [smem:[%s5847_s0 + %s4882_s20]]   ;;  %s4885_s7 = smov 14  }
   0xd   :  { %s4989_s30 = sld [smem:[%s5847_s0 + %s4883_s26]]   ;;  %s4886_s15 = smov 15  }
   0xe   :  { %s4994_s6 = sld [smem:[%s5847_s0 + %s4884_s1]]   ;;  %s4887_s22 = smov 16  }
   0xf   :  { %s4999_s12 = sld [smem:[%s5847_s0 + %s4885_s7]]   ;;  %s4888_s28 = smov 17  }
  0x10   :  { %s5004_s20 = sld [smem:[%s5847_s0 + %s4886_s15]]   ;;  %s4889_s7 = smov 18  }
  0x11   :  { %s5009_s27 = sld [smem:[%s5847_s0 + %s4887_s22]]   ;;  %s4890_s15 = smov 19  }
  0x12   :  { %s5014_s4 = sld [smem:[%s5847_s0 + %s4888_s28]]   ;;  %s4891_s22 = smov 20  }
  0x13   :  { %5861 = sst [smem:[#allocation2_spill]] %s4989_s30  ;;  %s4892_s28 = smov 21  }
  0x14   :  { %s5024_s30 = sld [smem:[%s5847_s0 + %s4890_s15]]   ;;  %s4894_s15 = smov 23  }
  0x15   :  { %5862 = sst [smem:[#allocation3_spill]] %s4999_s12 }
  0x16   :  { %s5019_s12 = sld [smem:[%s5847_s0 + %s4889_s7]]   ;;  %s4893_s7 = smov 22  }
  0x17   :  { %5863 = sst [smem:[#allocation4_spill]] %s5009_s27 }
  0x18   :  { %5864 = sst [smem:[#allocation5_spill]] %s5014_s4 }
  0x19   :  { %s5029_s27 = sld [smem:[%s5847_s0 + %s4891_s22]]   ;;  %s4895_s22 = smov 24  }
  0x1a   :  { %5866 = sst [smem:[#allocation7_spill]] %s5024_s30 }
  0x1b   :  { %s5034_s4 = sld [smem:[%s5847_s0 + %s4892_s28]]   ;;  %s4896_s28 = smov 25  }
  0x1c   :  { %5865 = sst [smem:[#allocation6_spill]] %s5019_s12 }
  0x1d   :  { %s5039_s12 = sld [smem:[%s5847_s0 + %s4893_s7]]   ;;  %s4897_s7 = smov 26  }
  0x1e   :  { %s5044_s30 = sld [smem:[%s5847_s0 + %s4894_s15]]   ;;  %s4898_s15 = smov 27  }
  0x1f   :  { %5867 = sst [smem:[#allocation8_spill]] %s5029_s27 }
  0x20   :  { %s5049_s27 = sld [smem:[%s5847_s0 + %s4895_s22]]   ;;  %s4899_s22 = smov 28  }
  0x21   :  { %5868 = sst [smem:[#allocation9_spill]] %s5034_s4 }
  0x22   :  { %s5054_s4 = sld [smem:[%s5847_s0 + %s4896_s28]]   ;;  %s4900_s28 = smov 29  }
  0x23   :  { %5869 = sst [smem:[#allocation10_spill]] %s5039_s12 }
  0x24   :  { %5870 = sst [smem:[#allocation11_spill]] %s5044_s30 }
  0x25   :  { %s5059_s12 = sld [smem:[%s5847_s0 + %s4897_s7]]   ;;  %s4901_s7 = smov 30  }
  0x26   :  { %5871 = sst [smem:[#allocation12_spill]] %s5049_s27 }
  0x27   :  { %s5064_s30 = sld [smem:[%s5847_s0 + %s4898_s15]]   ;;  %s4902_s15 = smov 31  }
  0x28   :  { %5872 = sst [smem:[#allocation13_spill]] %s5054_s4 }
  0x29   :  { %s5069_s27 = sld [smem:[%s5847_s0 + %s4899_s22]]   ;;  %s4903_s22 = smov 32  }
  0x2a   :  { %s5074_s4 = sld [smem:[%s5847_s0 + %s4900_s28]]   ;;  %s4904_s28 = smov 33  }
  0x2b   :  { %5873 = sst [smem:[#allocation14_spill]] %s5059_s12 }
  0x2c   :  { %s5079_s12 = sld [smem:[%s5847_s0 + %s4901_s7]]   ;;  %s4905_s7 = smov 34  }
  0x2d   :  { %5874 = sst [smem:[#allocation15_spill]] %s5064_s30 }
  0x2e   :  { %s5084_s30 = sld [smem:[%s5847_s0 + %s4902_s15]]   ;;  %s5101_s15 = smov 0  }
  0x2f   :  { %5875 = sst [smem:[#allocation16_spill]] %s5069_s27 }
  0x30   :  { %5876 = sst [smem:[#allocation17_spill]] %s5074_s4 }
  0x31   :  { %s5089_s27 = sld [smem:[%s5847_s0 + %s4903_s22]]  }
  0x32   :  { %5877 = sst [smem:[#allocation18_spill]] %s5079_s12 }
  0x33   :  { %s5094_s4 = sld [smem:[%s5847_s0 + %s4904_s28]]  }
  0x34   :  { %s5099_s12 = sld [smem:[%s5847_s0 + %s4905_s7]]  }
  0x35 LB: > { %s4603_s16 = sadd.s32 4294967295, %s4870_s15   ;;  %p4607_p0 = scmp.ge.s32.totalorder %s4870_s15, 1  ;;  %s4870_s15 = sphi %s5101_s15, %s79_s15  }
  0x36   : > { %p947_p1 = scmp.lt.s32.totalorder %s4870_s15, 3 }
  0x38   : > { %p948_p2 = pnand %p4607_p0, %p947_p1 }
  0x39   : > { %p1033_p3 = scmp.lt.s32.totalorder (!%p948_p2), %s4603_s16, 1  ;;  %v1063_v0 = vld [vmem:[%s4954_s25] sm:$0xff] (!%p948_p2)  ;;  %v4906_v1 = vmov (!%p948_p2), 0.0   ;;  %v4907_v2 = vmov (!%p948_p2), 0   ;;  %vm1083_vm0 = vcmask (!%p948_p2), 261120   ;;  %s4908_s22 = smov (!%p948_p2), 1   ;;  %v1261_v42 = vlaneseq (!%p948_p2) }
  0x3a   : > { %951 = sbr.rel (%p948_p2) target bundleno = 4459 (0x116b), region = 156  ;;  %1151 = vmatprep.mubr.f32.mxu0 (!%p948_p2), %v4906_v1  ;;  %1222 = vmatprep.mubr.f32.mxu1 (!%p948_p2), %v4906_v1  ;;  %v1062_v27 = vld [vmem:[%s4949_s21] sm:$0xff] (!%p948_p2)  ;;  %s4909_s23 = smov (!%p948_p2), 127   ;;  %vm1251_vm2 = vcmask (!%p948_p2), 7168   ;;  %vm1293_vm4 = vcmask (!%p948_p2), 1039360   ;;  %vm1332_vm5 = vcmask (!%p948_p2), 195584  }
  0x3b   : > { %4859 = vset.pattern.permute.xlu0 (!%p948_p2), %v4907_v2  ;;  %4860 = vset.pattern.permute.xlu1 (!%p948_p2), %v4907_v2  ;;  %v1065_v41 = vld [vmem:[%s4964_s3] sm:$0xff] (!%p948_p2)  ;;  %v1262_v44 = vshrl.u32 (!%p948_p2), %v1261_v42, 7  ;;  %s4910_s26 = smov (!%p948_p2), 8   ;;  %s4911_s28 = smov (!%p948_p2), 120   ;;  %vm1500_vm7 = vcmask (!%p948_p2), 64512   ;;  %vm1542_vm9 = vcmask (!%p948_p2), 982016  }
  0x3c   : > { %1080 = vperm.xlu0 (!%p948_p2), %4859, %v1063_v0   ;;  %v5173_v43 = vld [vmem:[%s4944_s17] sm:$0xf] (!%p948_p2)  ;;  %s4912_s1 = smov (!%p948_p2), 64   ;;  %vm1752_vm11 = vcmask (!%p948_p2), 523264   ;;  %s5878_s2 = sld [smem:[#allocation2_spill]] (!%p948_p2)  ;;  %vm2405_vm14 = vcmask (!%p948_p2), 15360  }
  0x3d   : > { %vm1233_vm1 = vcmp.ge.s32.totalorder (!%p948_p2), %v5173_v43, 1  ;;  %v5176_v45 = vsub.s32 (!%p948_p2), 0, %v1262_v44  ;;  %v5178_v46 = vsub.s32 (!%p948_p2), 3, %v1262_v44  ;;  %v5181_v48 = vsub.s32 (!%p948_p2), 1, %v1262_v44  ;;  %s5879_s7 = sld [smem:[#allocation3_spill]] (!%p948_p2)  ;;  %s5880_s10 = sld [smem:[#allocation5_spill]] (!%p948_p2) }
  0x3e   : > { %v4614_v47 = vsel (!%p948_p2), %vm1233_vm1, 1.0, %v4906_v1  ;;  %v5183_v49 = vsub.s32 (!%p948_p2), 2, %v1262_v44  ;;  %vm1236_vm3 = vcmp.lt.s32.totalorder (!%p948_p2), %v5173_v43, 7  ;;  %s4913_s11 = smov (!%p948_p2), 2   ;;  %vm2387_vm13 = vcmp.ge.s32.totalorder (!%p948_p2), %v5173_v43, 2 }
  0x3f   : > { %v1264_v52 = vrot.slane (!%p948_p2), %v4614_v47, %v5176_v45  ;;  %v1276_v53 = vrot.slane (!%p948_p2), %v4614_v47, %v5178_v46  ;;  %v1268_v55 = vrot.slane (!%p948_p2), %v4614_v47, %v5181_v48  ;;  %v4615_v58 = vsel (!%p948_p2), %vm1236_vm3, 1.0, %v4906_v1 }
  0x40   : > { %v1272_v56 = vrot.slane (!%p948_p2), %v4614_v47, %v5183_v49  ;;  %vm2390_vm15 = vcmp.lt.s32.totalorder (!%p948_p2), %v5173_v43, 6  ;;  %vm2447_vm1 = vcmask (!%p948_p2), 1031168   ;;  %vm2653_vm3 = vcmask (!%p948_p2), 130048  }
  0x41   : > { %s5906_s16 = smov (!%p1033_p3, %s4603_s16), 1 }
  0x42   : > { %s4680_s0 = sshll.u32 %s5906_s16, 7 }
  0x43   : > { %s1037_s18 = scalar_lea.vmem %s4929_s5, %s4680_s0 }
  0x44   : > { %v5118_v3 = vld [vmem:[%s1037_s18 + $0x8] sm:$0xff]  ;;  %v5122_v5 = vld [vmem:[%s1037_s18 + $0x18] sm:$0xff]  ;;  %v5128_v8 = vld [vmem:[%s1037_s18] sm:$0xff] }
  0x45   : > { %v5120_v4 = vld [vmem:[%s1037_s18 + $0x28] sm:$0xff]  ;;  %v5126_v7 = vld [vmem:[%s1037_s18 + $0x38] sm:$0xff]  ;;  %v5130_v9 = vld [vmem:[%s1037_s18 + $0x20] sm:$0xff] }
  0x46   : > { %v4682_v6 = vpack.c.bf16 %v5120_v4, %v5118_v3  ;;  %v4690_v10 = vpack.c.bf16 %v5126_v7, %v5122_v5  ;;  %v4684_v11 = vpack.c.bf16 %v5130_v9, %v5128_v8  ;;  %v5136_v12 = vld [vmem:[%s1037_s18 + $0x10] sm:$0xff]  ;;  %v5140_v14 = vld [vmem:[%s1037_s18 + $0x48] sm:$0xff]  ;;  %v5146_v17 = vld [vmem:[%s1037_s18 + $0x58] sm:$0xff] }
  0x47   : > { %v5138_v13 = vld [vmem:[%s1037_s18 + $0x30] sm:$0xff]  ;;  %v5144_v16 = vld [vmem:[%s1037_s18 + $0x68] sm:$0xff]  ;;  %v5148_v18 = vld [vmem:[%s1037_s18 + $0x78] sm:$0xff] }
  0x48   : > { %4683 = vmatprep.subr.bf16.mxu0 %v4682_v6  ;;  %v4692_v15 = vpack.c.bf16 %v5138_v13, %v5136_v12  ;;  %4691 = vmatprep.subr.bf16.mxu1 %v4690_v10  ;;  %v4686_v19 = vpack.c.bf16 %v5144_v16, %v5140_v14  ;;  %v4694_v20 = vpack.c.bf16 %v5148_v18, %v5146_v17  ;;  %v5154_v21 = vld [vmem:[%s1037_s18 + $0x40] sm:$0xff]  ;;  %v5158_v23 = vld [vmem:[%s1037_s18 + $0x50] sm:$0xff] }
  0x49   : > { %4685 = vmatpush1.bf16.msra.mxu0 %v4684_v11  ;;  %v5156_v22 = vld [vmem:[%s1037_s18 + $0x60] sm:$0xff]  ;;  %v5162_v25 = vld [vmem:[%s1037_s18 + $0x70] sm:$0xff]  ;;  %v1310_v10 = vrot.slane %v4615_v58, %v5181_v48  ;;  %s4914_s18 = smov 126  }
  0x4a   : > { %4693 = vmatpush1.bf16.msra.mxu1 %v4692_v15  ;;  %v4688_v24 = vpack.c.bf16 %v5156_v22, %v5154_v21  ;;  %4687 = vmatprep.subr.bf16.mxu0 %v4686_v19  ;;  %v4696_v26 = vpack.c.bf16 %v5162_v25, %v5158_v23 }
  0x4b   : > { %4695 = vmatprep.subr.bf16.mxu1 %v4694_v20 }
  0x4d   : > { %4689 = vmatpush1.bf16.msra.mxu0 %v4688_v24 }
  0x4e   : > { %4697 = vmatpush1.bf16.msra.mxu1 %v4696_v26 }
  0x50   : > { %4612 = vmatmul.mubr.msk.f32.vlgmr.msra.gmra.mrb[0].mxu0 %vm1083_vm0, %v1062_v27 }
  0x51   : > { %4613 = vmatmul.mubr.msk.f32.vlgmr.msra.gmra.mrb[0].mxu1 %vm1083_vm0, %v1062_v27  ;;  %1400 = vmatprep.mubr.f32.mxu0 %v4906_v1 }
  0x52   : > { %1471 = vmatprep.mubr.f32.mxu1 %v4906_v1 }
  0xbb   : > { %v1081_v28 = vpop.permute.xlu0 %1080 }
 0x123   : > { %v1153_v29 = vpop.f32.mrb[0].mxu0 }
 0x124   : > { %v1154_v30 = vadd.f32 %v1153_v29, %v1081_v28  ;;  %v1224_v31 = vpop.f32.mrb[0].mxu1  ;;  %v1155_v32 = vpop.f32.mrb[1].mxu0  ;;  %v1318_v29 = vrot.slane %v4615_v58, %v5178_v46 }
 0x125   : > { %v1225_v33 = vadd.f32 %v1224_v31, %v1081_v28  ;;  %v1226_v34 = vpop.f32.mrb[1].mxu1  ;;  %v1156_v38 = vadd.f32 %v1155_v32, %v1081_v28  ;;  %v1306_v31 = vrot.slane %v4615_v58, %v5176_v45 }
 0x126   : > { %v1229_v35 = vmax.f32 %v1154_v30, 0.0  ;;  %v1227_v36 = vadd.f32 %v1226_v34, %v1081_v28  ;;  %v1314_v28 = vrot.slane %v4615_v58, %v5183_v49 }
 0x127   : > { %v1231_v37 = vmax.f32 %v1225_v33, 0.0  ;;  %v1230_v40 = vmax.f32 %v1156_v38, 0.0 }
 0x128   : > { %1243 = vrot.lane.b32.xlu0 %v1229_v35, %s4908_s22  ;;  %v1232_v39 = vmax.f32 %v1227_v36, 0.0 }
 0x129   : > { %1247 = vrot.lane.b32.xlu1 %v1231_v37, %s4908_s22 }
 0x12c   : > { %1249 = vrot.lane.b32.xlu0 %v1232_v39, %s4908_s22 }
 0x12d   : > { %1245 = vrot.lane.b32.xlu1 %v1230_v40, %s4908_s22  ;;  %s5881_s22 = sld [smem:[#allocation4_spill]] }
 0x130   : > { %1289 = vrot.lane.b32.xlu0 %v1231_v37, %s4909_s23 }
 0x131   : > { %1287 = vrot.lane.b32.xlu1 %v1230_v40, %s4909_s23 }
 0x134   : > { %1291 = vrot.lane.b32.xlu0 %v1232_v39, %s4909_s23 }
 0x135   : > { %1285 = vrot.lane.b32.xlu1 %v1229_v35, %s4909_s23  ;;  %s5882_s23 = sld [smem:[#allocation7_spill]] }
 0x139   : > { %1329 = vperm.xlu1 %4860, %v1065_v41  }
 0x19a   : > { %v1244_v50 = vpop.permute.xlu0 %1243 }
 0x19b   : > { %v1248_v51 = vpop.permute.xlu1 %1247  ;;  %v1259_v54 = vsel %vm1251_vm2, 0.0, %v1244_v50 }
 0x19c   : > { %v1281_v61 = vmul.f32 %v1264_v52, %v1259_v54 }
 0x19e   : > { %v1250_v57 = vpop.permute.xlu0 %1249  ;;  %v4700_v26 = vpack.c.bf16 %v1229_v35, %v1281_v61 }
 0x19f   : > { %v1246_v59 = vpop.permute.xlu1 %1245  ;;  %v1254_v60 = vsel %vm1251_vm2, %v1248_v51, %v1250_v57 }
 0x1a0   : > { %v1252_v62 = vsel %vm1251_vm2, %v1244_v50, %v1246_v59  ;;  %v1253_v63 = vsel %vm1251_vm2, %v1246_v59, %v1248_v51  ;;  %v1284_v0 = vmul.f32 %v1276_v53, %v1254_v60  ;;  %v1067_v59 = vld [vmem:[%s4974_s14] sm:$0xff] }
 0x1a1   : > { %v1282_v2 = vmul.f32 %v1268_v55, %v1252_v62  ;;  %v1283_v6 = vmul.f32 %v1272_v56, %v1253_v63  ;;  %v5218_v60 = vld [vmem:[%s4939_s13] sm:$0xf] }
 0x1a2   : > { %v1290_v11 = vpop.permute.xlu0 %1289  ;;  %v4702_v15 = vpack.c.bf16 %v1232_v39, %v1284_v0  ;;  %vm1482_vm6 = vcmp.ge.s32.totalorder %v5218_v60, 1  ;;  %vm1485_vm8 = vcmp.lt.s32.totalorder %v5218_v60, 7  ;;  %vm2635_vm2 = vcmp.ge.s32.totalorder %v5218_v60, 2 }
 0x1a3   : > { %v4704_v19 = vpack.c.bf16 %v1231_v37, %v1283_v6  ;;  %v1288_v20 = vpop.permute.xlu1 %1287  ;;  %v4698_v24 = vpack.c.bf16 %v1230_v40, %v1282_v2  ;;  %v1064_v40 = vld [vmem:[%s4959_s29] sm:$0xff]  ;;  %v4618_v61 = vsel %vm1482_vm6, 1.0, %v4906_v1  ;;  %vm2695_vm6 = vcmask 916480  }
 0x1a4   : > { %v1295_v27 = vsel %vm1293_vm4, %v1288_v20, %v1290_v11  ;;  %4703 = vmatprep.subr.bf16.mxu1 %v4702_v15  ;;  %v1513_v62 = vrot.slane %v4618_v61, %v5176_v45  ;;  %v1517_v63 = vrot.slane %v4618_v61, %v5181_v48  ;;  %v1521_v15 = vrot.slane %v4618_v61, %v5183_v49 }
 0x1a5   : > { %v1324_v30 = vmul.f32 %v1310_v10, %v1295_v27  ;;  %4699 = vmatprep.subr.bf16.mxu0 %v4698_v24  ;;  %4705 = vmatpush1.bf16.msra.mxu1 %v4704_v19 }
 0x1a6   : > { %4701 = vmatpush1.bf16.msra.mxu0 %v4700_v26  ;;  %v1292_v32 = vpop.permute.xlu0 %1291  ;;  %v4619_v26 = vsel %vm1485_vm8, 1.0, %v4906_v1 }
 0x1a7   : > { %v1286_v33 = vpop.permute.xlu1 %1285  ;;  %1340 = vmatprep.subr.mxu0 %v1324_v30  ;;  %v1296_v34 = vsel %vm1293_vm4, %v1290_v11, %v1292_v32  ;;  %v1301_v35 = vsel %vm1293_vm4, %v1292_v32, 0.0 }
 0x1a8   : > { %v1294_v36 = vsel %vm1293_vm4, %v1286_v33, %v1288_v20  ;;  %v1325_v37 = vmul.f32 %v1314_v28, %v1296_v34  ;;  %v1326_v38 = vmul.f32 %v1318_v29, %v1301_v35  ;;  %v1525_v20 = vrot.slane %v4618_v61, %v5178_v46 }
 0x1a9   : > { %v1323_v39 = vmul.f32 %v1306_v31, %v1294_v36  ;;  %v1559_v34 = vrot.slane %v4619_v26, %v5181_v48  ;;  %vm2638_vm4 = vcmp.lt.s32.totalorder %v5218_v60, 6 }
 0x1aa   : > { %1411 = vmatprep.subr.mxu1 %v1326_v38 }
 0x1ab   : > { %1341 = vmatpush1.msra.mxu0 %v1323_v39  ;;  %1412 = vmatpush1.msra.mxu1 %v1325_v37 }
 0x1ac   : > { %4616 = vmatmul.mubr.msk.f32.vlgmr.msra.gmra.mrb[2].mxu0 %vm1332_vm5, %v1064_v40  ;;  %4617 = vmatmul.mubr.msk.f32.vlgmr.msra.gmra.mrb[2].mxu1 %vm1332_vm5, %v1064_v40  ;;  %v1555_v40 = vrot.slane %v4619_v26, %v5176_v45 }
 0x1ad   : > { %1648 = vmatprep.mubr.f32.mxu0 %v4906_v1  ;;  %1719 = vmatprep.mubr.f32.mxu1 %v4906_v1 }
 0x1b8   : > { %v1330_v41 = vpop.permute.xlu1 %1329 }
 0x27f   : > { %v1402_v42 = vpop.f32.mrb[2].mxu0  ;;  %v1473_v44 = vpop.f32.mrb[2].mxu1 }
 0x280   : > { %v5204_v47 = vadd.f32 %v1402_v42, %v1330_v41  ;;  %v1404_v50 = vpop.f32.mrb[3].mxu0  ;;  %v1475_v51 = vpop.f32.mrb[3].mxu1  ;;  %v5208_v53 = vadd.f32 %v1473_v44, %v1330_v41  ;;  %v1563_v42 = vrot.slane %v4619_v26, %v5183_v49  ;;  %v1567_v44 = vrot.slane %v4619_v26, %v5178_v46 }
 0x281   : > { %v5206_v52 = vadd.f32 %v1404_v50, %v1330_v41  ;;  %v5211_v55 = vadd.f32 %v1475_v51, %v1330_v41 }
 0x282   : > { %v1478_v54 = vmax.f32 %v5204_v47, 0.0  ;;  %v1480_v57 = vmax.f32 %v5208_v53, 0.0 }
 0x283   : > { %v1479_v56 = vmax.f32 %v5206_v52, 0.0  ;;  %v1481_v58 = vmax.f32 %v5211_v55, 0.0 }
 0x284   : > { %1492 = vrot.lane.b32.xlu0 %v1478_v54, %s4910_s26 }
 0x285   : > { %1494 = vrot.lane.b32.xlu1 %v1479_v56, %s4910_s26 }
 0x288   : > { %1496 = vrot.lane.b32.xlu0 %v1480_v57, %s4910_s26 }
 0x289   : > { %1498 = vrot.lane.b32.xlu1 %v1481_v58, %s4910_s26  ;;  %s5883_s26 = sld [smem:[#allocation9_spill]] }
 0x28c   : > { %1536 = vrot.lane.b32.xlu0 %v1479_v56, %s4911_s28 }
 0x28d   : > { %1538 = vrot.lane.b32.xlu1 %v1480_v57, %s4911_s28 }
 0x290   : > { %1534 = vrot.lane.b32.xlu0 %v1478_v54, %s4911_s28 }
 0x291   : > { %1540 = vrot.lane.b32.xlu1 %v1481_v58, %s4911_s28  ;;  %s4915_s28 = smov 16  }
 0x294   : > { %1578 = vperm.xlu0 %4859, %v1067_v59   ;;  %v1066_v59 = vld [vmem:[%s4969_s8] sm:$0xff] }
 0x2f6   : > { %v1493_v0 = vpop.permute.xlu0 %1492 }
 0x2f7   : > { %v1508_v2 = vsel %vm1500_vm7, 0.0, %v1493_v0  ;;  %v1495_v6 = vpop.permute.xlu1 %1494 }
 0x2f8   : > { %v1530_v10 = vmul.f32 %v1513_v62, %v1508_v2  ;;  %v1501_v11 = vsel %vm1500_vm7, %v1493_v0, %v1495_v6 }
 0x2f9   : > { %v1531_v19 = vmul.f32 %v1517_v63, %v1501_v11 }
 0x2fa   : > { %v1497_v24 = vpop.permute.xlu0 %1496  ;;  %v4708_v30 = vpack.c.bf16 %v1478_v54, %v1530_v10 }
 0x2fb   : > { %v1502_v27 = vsel %vm1500_vm7, %v1495_v6, %v1497_v24  ;;  %v1499_v28 = vpop.permute.xlu1 %1498  ;;  %v4706_v29 = vpack.c.bf16 %v1479_v56, %v1531_v19 }
 0x2fc   : > { %v1532_v31 = vmul.f32 %v1521_v15, %v1502_v27  ;;  %v1503_v32 = vsel %vm1500_vm7, %v1497_v24, %v1499_v28 }
 0x2fd   : > { %v1533_v33 = vmul.f32 %v1525_v20, %v1503_v32  ;;  %4707 = vmatprep.subr.bf16.mxu0 %v4706_v29 }
 0x2fe   : > { %4709 = vmatpush1.bf16.msra.mxu0 %v4708_v30  ;;  %v1537_v35 = vpop.permute.xlu0 %1536  ;;  %v4712_v38 = vpack.c.bf16 %v1480_v57, %v1532_v31 }
 0x2ff   : > { %v1539_v36 = vpop.permute.xlu1 %1538  ;;  %v4710_v37 = vpack.c.bf16 %v1481_v58, %v1533_v33  ;;  %v1069_v33 = vld [vmem:[%s4984_s24] sm:$0xff] }
 0x300   : > { %v1544_v39 = vsel %vm1542_vm9, %v1537_v35, %v1539_v36 }
 0x301   : > { %v1573_v41 = vmul.f32 %v1559_v34, %v1544_v39  ;;  %4711 = vmatprep.subr.bf16.mxu1 %v4710_v37  ;;  %v1074_v34 = vld [vmem:[%s4994_s6] sm:$0xff]  ;;  %v1077_v37 = vld [vmem:[%s4994_s6 + $0x18] sm:$0xff] }
 0x302   : > { %4713 = vmatpush1.bf16.msra.mxu1 %v4712_v38  ;;  %v1535_v50 = vpop.permute.xlu0 %1534  ;;  %v2218_v38 = vld [vmem:[%s5004_s20] sm:$0xff] }
 0x303   : > { %v1543_v51 = vsel %vm1542_vm9, %v1535_v50, %v1537_v35  ;;  %v1541_v54 = vpop.permute.xlu1 %1540  ;;  %1588 = vmatprep.subr.mxu0 %v1573_v41  ;;  %v1075_v35 = vld [vmem:[%s4994_s6 + $0x8] sm:$0xff]  ;;  %v5272_v39 = vld [vmem:[%s4934_s9] sm:$0xf] }
 0x304   : > { %v1572_v56 = vmul.f32 %v1555_v40, %v1543_v51  ;;  %v1545_v58 = vsel %vm1542_vm9, %v1539_v36, %v1541_v54  ;;  %v1550_v57 = vsel %vm1542_vm9, %v1541_v54, 0.0  ;;  %v1076_v36 = vld [vmem:[%s4994_s6 + $0x10] sm:$0xff]  ;;  %vm1734_vm10 = vcmp.ge.s32.totalorder %v5272_v39, 1 }
 0x305   : > { %v1574_v61 = vmul.f32 %v1563_v42, %v1545_v58  ;;  %v1575_v62 = vmul.f32 %v1567_v44, %v1550_v57  ;;  %v4622_v40 = vsel %vm1734_vm10, 1.0, %v4906_v1  ;;  %vm1737_vm12 = vcmp.lt.s32.totalorder %v5272_v39, 7 }
 0x306   : > { %1589 = vmatpush1.msra.mxu0 %v1572_v56  ;;  %v1765_v41 = vrot.slane %v4622_v40, %v5176_v45  ;;  %v1769_v42 = vrot.slane %v4622_v40, %v5181_v48  ;;  %v4623_v51 = vsel %vm1737_vm12, 1.0, %v4906_v1  ;;  %v1773_v57 = vrot.slane %v4622_v40, %v5183_v49 }
 0x307   : > { %4620 = vmatmul.mubr.msk.f32.vlgmr.msra.gmra.mrb[4].mxu0 %vm1332_vm5, %v1066_v59  ;;  %1659 = vmatprep.subr.mxu1 %v1575_v62  ;;  %v1777_v62 = vrot.slane %v4622_v40, %v5178_v46  ;;  %v1800_v40 = vrot.slane %v4623_v51, %v5183_v49  ;;  %vm2887_vm8 = vcmp.ge.s32.totalorder %v5272_v39, 2  ;;  %vm2890_vm9 = vcmp.lt.s32.totalorder %v5272_v39, 6 }
 0x308   : > { %1660 = vmatpush1.msra.mxu1 %v1574_v61  ;;  %1885 = vmatprep.mubr.f32.mxu0 %v4906_v1  ;;  %vm3535_vm10 = vcmask 23552  }
 0x309   : > { %4621 = vmatmul.mubr.msk.f32.vlgmr.msra.gmra.mrb[4].mxu1 %vm1332_vm5, %v1066_v59  ;;  %v1796_v59 = vrot.slane %v4623_v51, %v5181_v48 }
 0x30a   : > { %1956 = vmatprep.mubr.f32.mxu1 %v4906_v1 }
 0x313   : > { %v1579_v63 = vpop.permute.xlu0 %1578 }
 0x3da   : > { %v1650_v0 = vpop.f32.mrb[4].mxu0 }
 0x3db   : > { %v1651_v2 = vadd.f32 %v1650_v0, %v1579_v63  ;;  %v1652_v6 = vpop.f32.mrb[5].mxu0  ;;  %v1792_v0 = vrot.slane %v4623_v51, %v5176_v45 }
 0x3dc   : > { %v1653_v10 = vadd.f32 %v1652_v6, %v1579_v63  ;;  %v1721_v11 = vpop.f32.mrb[4].mxu1 }
 0x3dd   : > { %v5246_v15 = vadd.f32 %v1651_v2, %v5204_v47  ;;  %v1722_v19 = vadd.f32 %v1721_v11, %v1579_v63  ;;  %v1723_v20 = vpop.f32.mrb[5].mxu1 }
 0x3de   : > { %v5249_v24 = vadd.f32 %v1653_v10, %v5206_v52  ;;  %v1724_v26 = vadd.f32 %v1723_v20, %v1579_v63 }
 0x3df   : > { %v5252_v27 = vadd.f32 %v1722_v19, %v5208_v53  ;;  %v1730_v28 = vmax.f32 %v5246_v15, 0.0 }
 0x3e0   : > { %v5256_v29 = vadd.f32 %v1724_v26, %v5211_v55  ;;  %v1731_v30 = vmax.f32 %v5249_v24, 0.0 }
 0x3e1   : > { %1744 = vrot.lane.b32.xlu1 %v1730_v28, %s4912_s1  ;;  %v1732_v31 = vmax.f32 %v5252_v27, 0.0 }
 0x3e2   : > { %1746 = vrot.lane.b32.xlu0 %v1731_v30, %s4912_s1  ;;  %v1733_v32 = vmax.f32 %v5256_v29, 0.0 }
 0x3e5   : > { %1748 = vrot.lane.b32.xlu1 %v1732_v31, %s4912_s1 }
 0x3e6   : > { %1750 = vrot.lane.b32.xlu0 %v1733_v32, %s4912_s1 }
 0x3e9   : > { %1815 = vperm.xlu1 %4860, %v1069_v33   ;;  %v1804_v33 = vrot.slane %v4623_v51, %v5178_v46 }
 0x3ea   : > { %1977 = vperm.xlu0 %4859, %v1074_v34  }
 0x3ed   : > { %1982 = vperm.xlu1 %4860, %v1075_v35  }
 0x3ee   : > { %1987 = vperm.xlu0 %4859, %v1076_v36  }
 0x3f1   : > { %1992 = vperm.xlu1 %4860, %v1077_v37  }
 0x3f2   : > { %2235 = vperm.xlu0 %4859, %v2218_v38  }
 0x453   : > { %v1745_v44 = vpop.permute.xlu1 %1744 }
 0x454   : > { %v1760_v50 = vsel %vm1752_vm11, 0.0, %v1745_v44  ;;  %v1747_v54 = vpop.permute.xlu0 %1746 }
 0x455   : > { %v1782_v56 = vmul.f32 %v1765_v41, %v1760_v50  ;;  %v1753_v58 = vsel %vm1752_vm11, %v1745_v44, %v1747_v54  ;;  %v1068_v41 = vld [vmem:[%s4979_s19] sm:$0xff] }
 0x456   : > { %v1783_v61 = vmul.f32 %v1769_v42, %v1753_v58  ;;  %v1809_v37 = vmul.f32 %v1792_v0, %v1753_v58 }
 0x457   : > { %v1749_v63 = vpop.permute.xlu1 %1748  ;;  %v4716_v11 = vpack.c.bf16 %v1730_v28, %v1782_v56 }
 0x458   : > { %v1754_v2 = vsel %vm1752_vm11, %v1747_v54, %v1749_v63  ;;  %v1751_v6 = vpop.permute.xlu0 %1750  ;;  %v4714_v10 = vpack.c.bf16 %v1731_v30, %v1783_v61 }
 0x459   : > { %v1784_v19 = vmul.f32 %v1773_v57, %v1754_v2  ;;  %v1810_v20 = vmul.f32 %v1796_v59, %v1754_v2  ;;  %v1755_v26 = vsel %vm1752_vm11, %v1749_v63, %v1751_v6  ;;  %v1787_v35 = vsel %vm1752_vm11, %v1751_v6, 0.0 }
 0x45a   : > { %v1785_v34 = vmul.f32 %v1777_v62, %v1755_v26  ;;  %4715 = vmatprep.subr.bf16.mxu0 %v4714_v10  ;;  %v1812_v30 = vmul.f32 %v1804_v33, %v1787_v35  ;;  %v1811_v28 = vmul.f32 %v1800_v40, %v1755_v26 }
 0x45b   : > { %4717 = vmatpush1.bf16.msra.mxu0 %v4716_v11  ;;  %v4720_v38 = vpack.c.bf16 %v1732_v31, %v1784_v19 }
 0x45c   : > { %1825 = vmatprep.subr.mxu0 %v1810_v20  ;;  %v4718_v36 = vpack.c.bf16 %v1733_v32, %v1785_v34 }
 0x45e   : > { %4719 = vmatprep.subr.bf16.mxu1 %v4718_v36 }
 0x45f   : > { %1826 = vmatpush1.msra.mxu0 %v1809_v37  ;;  %4721 = vmatpush1.bf16.msra.mxu1 %v4720_v38 }
 0x460   : > { %4624 = vmatmul.mubr.msk.f32.vlgmr.msra.gmra.mrb[6].mxu0 %vm1332_vm5, %v1068_v41  ;;  %1896 = vmatprep.subr.mxu1 %v1812_v30 }
 0x461   : > { %2071 = vmatprep.mubr.f32.mxu0 %v4906_v1 }
 0x463   : > { %1897 = vmatpush1.msra.mxu1 %v1811_v28 }
 0x464   : > { %4625 = vmatmul.mubr.msk.f32.vlgmr.msra.gmra.mrb[6].mxu1 %vm1332_vm5, %v1068_v41 }
 0x465   : > { %2160 = vmatprep.mubr.f32.mxu1 %v4906_v1 }
 0x468   : > { %v1816_v32 = vpop.permute.xlu1 %1815 }
 0x46c   : > { %v1983_v26 = vpop.permute.xlu1 %1982 }
 0x533   : > { %v1887_v31 = vpop.f32.mrb[6].mxu0 }
 0x534   : > { %v1888_v42 = vadd.f32 %v1887_v31, %v1816_v32  ;;  %v1889_v44 = vpop.f32.mrb[7].mxu0 }
 0x535   : > { %v1890_v50 = vadd.f32 %v1889_v44, %v1816_v32 }
 0x536   : > { %v1963_v51 = vadd.f32 %v1888_v42, %v5204_v47  ;;  %v1070_v47 = vld [vmem:[%s5878_s2] sm:$0xff] }
 0x537   : > { %v1964_v54 = vadd.f32 %v1890_v50, %v5206_v52  ;;  %v1958_v56 = vpop.f32.mrb[6].mxu1 }
 0x538   : > { %v1967_v58 = vadd.f32 %v1963_v51, %v5246_v15  ;;  %v1959_v57 = vadd.f32 %v1958_v56, %v1816_v32  ;;  %v1960_v59 = vpop.f32.mrb[7].mxu1 }
 0x539   : > { %v1961_v61 = vadd.f32 %v1960_v59, %v1816_v32  ;;  %v1968_v62 = vadd.f32 %v1964_v54, %v5249_v24  ;;  %v1073_v24 = vld [vmem:[%s5878_s2 + $0x18] sm:$0xff] }
 0x53a   : > { %v1965_v63 = vadd.f32 %v1959_v57, %v5208_v53  ;;  %v1971_v6 = vmax.f32 %v1967_v58, 0.0  ;;  %v1071_v53 = vld [vmem:[%s5878_s2 + $0x8] sm:$0xff] }
 0x53b   : > { %v1966_v0 = vadd.f32 %v1961_v61, %v5211_v55  ;;  %v1972_v2 = vmax.f32 %v1968_v62, 0.0  ;;  %v1072_v55 = vld [vmem:[%s5878_s2 + $0x10] sm:$0xff]  ;;  %v1993_v62 = vpop.permute.xlu1 %1992 }
 0x53c   : > { %v1969_v10 = vadd.f32 %v1965_v63, %v5252_v27 }
 0x53d   : > { %2007 = vmatprep.subr.mxu0 %v1972_v2  ;;  %v1970_v52 = vadd.f32 %v1966_v0, %v5256_v29  ;;  %v1978_v29 = vpop.permute.xlu0 %1977 }
 0x53e   : > { %2008 = vmatpush1.msra.mxu0 %v1971_v6  ;;  %v1973_v11 = vmax.f32 %v1969_v10, 0.0 }
 0x53f   : > { %4626 = vmatmul.mubr.msk.f32.vlgmr.msra.gmra.mrb[8].mxu0 %vm1500_vm7, %v1070_v47  ;;  %v1974_v15 = vmax.f32 %v1970_v52, 0.0 }
 0x540   : > { %2077 = vmatprep.mubr.f32.mxu0 %v4906_v1 }
 0x541   : > { %2096 = vmatprep.subr.mxu1 %v1974_v15  ;;  %v1988_v28 = vpop.permute.xlu0 %1987 }
 0x542   : > { %2097 = vmatpush1.msra.mxu1 %v1973_v11 }
 0x543   : > { %4627 = vmatmul.mubr.msk.f32.gmra.mrb[10].mxu0 %vm1500_vm7, %v1071_v53  ;;  %4630 = vmatmul.mubr.msk.f32.vlgmr.msra.gmra.mrb[8].mxu1 %vm1500_vm7, %v1070_v47 }
 0x544   : > { %2083 = vmatprep.mubr.f32.mxu0 %v4906_v1  ;;  %2166 = vmatprep.mubr.f32.mxu1 %v4906_v1 }
 0x547   : > { %4628 = vmatmul.mubr.msk.f32.gmra.mrb[12].mxu0 %vm1500_vm7, %v1072_v55  ;;  %4631 = vmatmul.mubr.msk.f32.gmra.mrb[10].mxu1 %vm1500_vm7, %v1071_v53 }
 0x548   : > { %2089 = vmatprep.mubr.f32.mxu0 %v4906_v1  ;;  %2172 = vmatprep.mubr.f32.mxu1 %v4906_v1 }
 0x54b   : > { %4629 = vmatmul.mubr.msk.f32.gmra.mrb[14].mxu0 %vm1500_vm7, %v1073_v24  ;;  %4632 = vmatmul.mubr.msk.f32.gmra.mrb[12].mxu1 %vm1500_vm7, %v1072_v55 }
 0x54c   : > { %2178 = vmatprep.mubr.f32.mxu1 %v4906_v1  ;;  %2305 = vmatprep.mubr.f32.mxu0 %v4906_v1 }
 0x54f   : > { %4633 = vmatmul.mubr.msk.f32.gmra.mrb[14].mxu1 %vm1500_vm7, %v1073_v24 }
 0x550   : > { %2376 = vmatprep.mubr.f32.mxu1 %v4906_v1 }
 0x612   : > { %v2073_v27 = vpop.f32.mrb[8].mxu0 }
 0x613   : > { %v2075_v19 = vpop.f32.mrb[9].mxu0  ;;  %v2074_v33 = vadd.f32 %v2073_v27, %v1978_v29 }
 0x614   : > { %v2076_v20 = vadd.f32 %v2075_v19, %v1978_v29 }
 0x615   : > { %v5328_v32 = vadd.f32 %v2074_v33, %v5128_v8 }
 0x616   : > { %v2079_v34 = vpop.f32.mrb[10].mxu0  ;;  %v2162_v35 = vpop.f32.mrb[8].mxu1  ;;  %v5325_v40 = vadd.f32 %v2076_v20, %v5118_v3 }
 0x617   : > { %v2080_v36 = vadd.f32 %v2079_v34, %v1983_v26  ;;  %v2081_v37 = vpop.f32.mrb[11].mxu0  ;;  %v2164_v38 = vpop.f32.mrb[9].mxu1  ;;  %v2163_v42 = vadd.f32 %v2162_v35, %v1978_v29 }
 0x618   : > { %v2082_v41 = vadd.f32 %v2081_v37, %v1983_v26  ;;  %v2165_v30 = vadd.f32 %v2164_v38, %v1978_v29  ;;  %v2202_v8 = vmax.f32 %v5325_v40, 0.0 }
 0x619   : > { %v5331_v31 = vadd.f32 %v2080_v36, %v5130_v9  ;;  %v5344_v63 = vadd.f32 %v2163_v42, %v5136_v12 }
 0x61a   : > { %v5334_v44 = vadd.f32 %v2082_v41, %v5120_v4  ;;  %v2085_v50 = vpop.f32.mrb[12].mxu0  ;;  %v2168_v51 = vpop.f32.mrb[10].mxu1  ;;  %v5338_v3 = vadd.f32 %v2165_v30, %v5122_v5  ;;  %v2201_v4 = vmax.f32 %v5328_v32, 0.0 }
 0x61b   : > { %v2205_v54 = vmax.f32 %v5331_v31, 0.0  ;;  %v2169_v56 = vadd.f32 %v2168_v51, %v1983_v26  ;;  %v2087_v58 = vpop.f32.mrb[13].mxu0  ;;  %v2170_v57 = vpop.f32.mrb[11].mxu1  ;;  %v2086_v0 = vadd.f32 %v2085_v50, %v1988_v28  ;;  %v2203_v29 = vmax.f32 %v5344_v63, 0.0 }
 0x61c   : > { %v2206_v59 = vmax.f32 %v5334_v44, 0.0  ;;  %v2088_v9 = vadd.f32 %v2087_v58, %v1988_v28  ;;  %v2171_v61 = vadd.f32 %v2170_v57, %v1983_v26  ;;  %v2204_v52 = vmax.f32 %v5338_v3, 0.0  ;;  %v2217_v58 = vld [vmem:[%s5879_s7] sm:$0xff]  ;;  %s5884_s7 = sld [smem:[#allocation11_spill]] }
 0x61d   : > { %v5347_v2 = vadd.f32 %v2169_v56, %v5138_v13  ;;  %v4724_v12 = vpack.c.bf16 %v2205_v54, %v2201_v4  ;;  %v5368_v19 = vadd.f32 %v2086_v0, %v5154_v21 }
 0x61e   : > { %v5350_v5 = vadd.f32 %v2171_v61, %v5126_v7  ;;  %v2091_v6 = vpop.f32.mrb[14].mxu0  ;;  %v2174_v10 = vpop.f32.mrb[12].mxu1  ;;  %v4722_v47 = vpack.c.bf16 %v2206_v59, %v2202_v8  ;;  %v5363_v53 = vadd.f32 %v2088_v9, %v5140_v14 }
 0x61f   : > { %v2207_v13 = vmax.f32 %v5347_v2, 0.0  ;;  %v2092_v15 = vadd.f32 %v2091_v6, %v1993_v62  ;;  %v2093_v11 = vpop.f32.mrb[15].mxu0  ;;  %v2176_v7 = vpop.f32.mrb[13].mxu1  ;;  %v2175_v26 = vadd.f32 %v2174_v10, %v1988_v28  ;;  %v2209_v30 = vmax.f32 %v5368_v19, 0.0 }
 0x620   : > { %v2208_v55 = vmax.f32 %v5350_v5, 0.0  ;;  %v2094_v24 = vadd.f32 %v2093_v11, %v1993_v62  ;;  %v2177_v27 = vadd.f32 %v2176_v7, %v1988_v28  ;;  %4723 = vmatprep.subr.bf16.mxu0 %v4722_v47  ;;  %v2210_v37 = vmax.f32 %v5363_v53, 0.0  ;;  %v2236_v61 = vpop.permute.xlu0 %2235 }
 0x621   : > { %v5371_v20 = vadd.f32 %v2092_v15, %v5156_v22  ;;  %4725 = vmatpush1.bf16.msra.mxu0 %v4724_v12  ;;  %v4732_v21 = vpack.c.bf16 %v2207_v13, %v2203_v29  ;;  %v5392_v28 = vadd.f32 %v2175_v26, %v5158_v23 }
 0x622   : > { %v5374_v33 = vadd.f32 %v2094_v24, %v5144_v16  ;;  %v2180_v14 = vpop.f32.mrb[14].mxu1  ;;  %v4730_v34 = vpack.c.bf16 %v2208_v55, %v2204_v52  ;;  %v5388_v38 = vadd.f32 %v2177_v27, %v5146_v17 }
 0x623   : > { %v2213_v35 = vmax.f32 %v5371_v20, 0.0  ;;  %v2181_v22 = vadd.f32 %v2180_v14, %v1993_v62  ;;  %v2182_v36 = vpop.f32.mrb[15].mxu1  ;;  %v2220_v14 = vld [vmem:[%s5880_s10] sm:$0xff]  ;;  %s4916_s10 = smov 112   ;;  %v5890_v19 = vmax.f32 %v5392_v28, 0.0 }
 0x624   : > { %v5854_v16 = vmax.f32 %v5374_v33, 0.0  ;;  %v2183_v41 = vadd.f32 %v2182_v36, %v1993_v62  ;;  %4731 = vmatprep.subr.bf16.mxu1 %v4730_v34  ;;  %v2212_v56 = vmax.f32 %v5388_v38, 0.0  ;;  %v4636_v34 = vsel %vm2387_vm13, 1.0, %v4906_v1 }
 0x625   : > { %v5395_v42 = vadd.f32 %v2181_v22, %v5162_v25  ;;  %4733 = vmatpush1.bf16.msra.mxu1 %v4732_v21  ;;  %v4728_v51 = vpack.c.bf16 %v2213_v35, %v2209_v30  ;;  %v2418_v21 = vrot.slane %v4636_v34, %v5176_v45  ;;  %v2422_v22 = vrot.slane %v4636_v34, %v5181_v48 }
 0x626   : > { %v5398_v50 = vadd.f32 %v2183_v41, %v5148_v18  ;;  %v4726_v17 = vpack.c.bf16 %v5854_v16, %v2210_v37  ;;  %v5853_v18 = vmax.f32 %v5392_v28, 0.0  ;;  %vm3577_vm13 = vcmask 1022976  }
 0x627   : > { %v5852_v23 = vmax.f32 %v5395_v42, 0.0 }
 0x628   : > { %v5851_v25 = vmax.f32 %v5398_v50, 0.0  ;;  %4727 = vmatprep.subr.bf16.mxu0 %v4726_v17 }
 0x629   : > { %4729 = vmatpush1.bf16.msra.mxu0 %v4728_v51  ;;  %v4736_v9 = vpack.c.bf16 %v5852_v23, %v5853_v18 }
 0x62a   : > { %v4734_v57 = vpack.c.bf16 %v5851_v25, %v2212_v56 }
 0x62c   : > { %4634 = vmatmul.mubr.msk.f32.vlgmr.msra.gmra.mrb[16].mxu0 %vm1083_vm0, %v2217_v58  ;;  %4735 = vmatprep.subr.bf16.mxu1 %v4734_v57  ;;  %v2426_v57 = vrot.slane %v4636_v34, %v5183_v49 }
 0x62d   : > { %4737 = vmatpush1.bf16.msra.mxu1 %v4736_v9  ;;  %2553 = vmatprep.mubr.f32.mxu0 %v4906_v1 }
 0x630   : > { %4635 = vmatmul.mubr.msk.f32.vlgmr.msra.gmra.mrb[16].mxu1 %vm1083_vm0, %v2217_v58 }
 0x631   : > { %2624 = vmatprep.mubr.f32.mxu1 %v4906_v1 }
 0x6ff   : > { %v2307_v62 = vpop.f32.mrb[16].mxu0 }
 0x700   : > { %v2308_v0 = vadd.f32 %v2307_v62, %v2236_v61  ;;  %v2309_v6 = vpop.f32.mrb[17].mxu0 }
 0x701   : > { %v2310_v10 = vadd.f32 %v2309_v6, %v2236_v61 }
 0x702   : > { %v2383_v47 = vmax.f32 %v2308_v0, 0.0  ;;  %v4637_v0 = vsel %vm2390_vm15, 1.0, %v4906_v1 }
 0x703   : > { %v2384_v12 = vmax.f32 %v2310_v10, 0.0  ;;  %v2378_v15 = vpop.f32.mrb[16].mxu1 }
 0x704   : > { %v2379_v11 = vadd.f32 %v2378_v15, %v2236_v61  ;;  %v2380_v7 = vpop.f32.mrb[17].mxu1  ;;  %2397 = vrot.lane.b32.xlu1 %v2383_v47, %s4913_s11 }
 0x705   : > { %v2381_v24 = vadd.f32 %v2380_v7, %v2236_v61  ;;  %2399 = vrot.lane.b32.xlu0 %v2384_v12, %s4913_s11  ;;  %v2430_v61 = vrot.slane %v4636_v34, %v5178_v46 }
 0x706   : > { %v2385_v27 = vmax.f32 %v2379_v11, 0.0 }
 0x707   : > { %v2386_v26 = vmax.f32 %v2381_v24, 0.0 }
 0x708   : > { %2401 = vrot.lane.b32.xlu1 %v2385_v27, %s4913_s11 }
 0x709   : > { %2403 = vrot.lane.b32.xlu0 %v2386_v26, %s4913_s11  ;;  %s5885_s11 = sld [smem:[#allocation13_spill]] }
 0x70c   : > { %2441 = vrot.lane.b32.xlu1 %v2384_v12, %s4914_s18 }
 0x70d   : > { %2443 = vrot.lane.b32.xlu0 %v2385_v27, %s4914_s18 }
 0x710   : > { %2439 = vrot.lane.b32.xlu1 %v2383_v47, %s4914_s18 }
 0x711   : > { %2445 = vrot.lane.b32.xlu0 %v2386_v26, %s4914_s18  ;;  %s5886_s18 = sld [smem:[#allocation6_spill]] }
 0x714   : > { %2483 = vperm.xlu1 %4860, %v2220_v14   ;;  %v2464_v14 = vrot.slane %v4637_v0, %v5181_v48 }
 0x776   : > { %v2398_v36 = vpop.permute.xlu1 %2397 }
 0x777   : > { %v2413_v41 = vsel %vm2405_vm14, 0.0, %v2398_v36  ;;  %v2400_v17 = vpop.permute.xlu0 %2399 }
 0x778   : > { %v2435_v51 = vmul.f32 %v2418_v21, %v2413_v41  ;;  %v2406_v58 = vsel %vm2405_vm14, %v2398_v36, %v2400_v17 }
 0x779   : > { %v2436_v9 = vmul.f32 %v2422_v22, %v2406_v58 }
 0x77a   : > { %v2402_v62 = vpop.permute.xlu1 %2401  ;;  %v4740_v11 = vpack.c.bf16 %v2383_v47, %v2435_v51  ;;  %v2468_v47 = vrot.slane %v4637_v0, %v5183_v49  ;;  %v2472_v51 = vrot.slane %v4637_v0, %v5178_v46 }
 0x77b   : > { %v2407_v6 = vsel %vm2405_vm14, %v2400_v17, %v2402_v62  ;;  %v2404_v10 = vpop.permute.xlu0 %2403  ;;  %v4738_v15 = vpack.c.bf16 %v2384_v12, %v2436_v9  ;;  %v2460_v17 = vrot.slane %v4637_v0, %v5176_v45 }
 0x77c   : > { %v2437_v7 = vmul.f32 %v2426_v57, %v2407_v6  ;;  %v2408_v24 = vsel %vm2405_vm14, %v2402_v62, %v2404_v10  ;;  %v2219_v62 = vld [vmem:[%s5881_s22] sm:$0xff]  ;;  %s5887_s22 = sld [smem:[#allocation8_spill]] }
 0x77d   : > { %v2438_v43 = vmul.f32 %v2430_v61, %v2408_v24  ;;  %4739 = vmatprep.subr.bf16.mxu0 %v4738_v15 }
 0x77e   : > { %4741 = vmatpush1.bf16.msra.mxu0 %v4740_v11  ;;  %v2442_v21 = vpop.permute.xlu1 %2441  ;;  %v4744_v36 = vpack.c.bf16 %v2385_v27, %v2437_v7 }
 0x77f   : > { %v2444_v22 = vpop.permute.xlu0 %2443  ;;  %v4742_v34 = vpack.c.bf16 %v2386_v26, %v2438_v43 }
 0x780   : > { %v2449_v41 = vsel %vm2447_vm1, %v2442_v21, %v2444_v22 }
 0x781   : > { %v2478_v12 = vmul.f32 %v2464_v14, %v2449_v41  ;;  %4743 = vmatprep.subr.bf16.mxu1 %v4742_v34 }
 0x782   : > { %4745 = vmatpush1.bf16.msra.mxu1 %v4744_v36  ;;  %v2440_v58 = vpop.permute.xlu1 %2439 }
 0x783   : > { %v2448_v57 = vsel %vm2447_vm1, %v2440_v58, %v2442_v21  ;;  %v2446_v9 = vpop.permute.xlu0 %2445  ;;  %2493 = vmatprep.subr.mxu0 %v2478_v12  ;;  %v2222_v12 = vld [vmem:[%s5882_s23] sm:$0xff]  ;;  %v2230_v58 = vld [vmem:[%s5884_s7 + $0x8] sm:$0xff]  ;;  %s5888_s23 = sld [smem:[#allocation10_spill]] }
 0x784   : > { %v2477_v61 = vmul.f32 %v2460_v17, %v2448_v57  ;;  %v2450_v26 = vsel %vm2447_vm1, %v2444_v22, %v2446_v9  ;;  %v2455_v27 = vsel %vm2447_vm1, %v2446_v9, 0.0  ;;  %v2231_v57 = vld [vmem:[%s5884_s7 + $0x10] sm:$0xff]  ;;  %v2232_v9 = vld [vmem:[%s5884_s7 + $0x18] sm:$0xff]  ;;  %vm3824_vm1 = vcmask 850944  }
 0x785   : > { %v2479_v6 = vmul.f32 %v2468_v47, %v2450_v26  ;;  %v2480_v10 = vmul.f32 %v2472_v51, %v2455_v27  ;;  %v2224_v47 = vld [vmem:[%s5883_s26] sm:$0xff]  ;;  %v4640_v26 = vsel %vm2635_vm2, 1.0, %v4906_v1  ;;  %s5892_s26 = sld [smem:[#allocation12_spill]] }
 0x786   : > { %2494 = vmatpush1.msra.mxu0 %v2477_v61  ;;  %v2229_v51 = vld [vmem:[%s5884_s7] sm:$0xff]  ;;  %v2666_v27 = vrot.slane %v4640_v26, %v5176_v45 }
 0x787   : > { %4638 = vmatmul.mubr.msk.f32.vlgmr.msra.gmra.mrb[18].mxu0 %vm1332_vm5, %v2219_v62  ;;  %2564 = vmatprep.subr.mxu1 %v2480_v10  ;;  %v3348_v61 = vld [vmem:[%s5885_s11] sm:$0xff]  ;;  %s4918_s11 = smov 125  }
 0x788   : > { %2565 = vmatpush1.msra.mxu1 %v2479_v6  ;;  %2801 = vmatprep.mubr.f32.mxu0 %v4906_v1 }
 0x789   : > { %4639 = vmatmul.mubr.msk.f32.vlgmr.msra.gmra.mrb[18].mxu1 %vm1332_vm5, %v2219_v62  ;;  %v2670_v62 = vrot.slane %v4640_v26, %v5181_v48 }
 0x78a   : > { %2872 = vmatprep.mubr.f32.mxu1 %v4906_v1 }
 0x793   : > { %v2484_v0 = vpop.permute.xlu1 %2483 }
 0x85a   : > { %v2555_v15 = vpop.f32.mrb[18].mxu0 }
 0x85b   : > { %v5451_v11 = vadd.f32 %v2555_v15, %v2484_v0  ;;  %v2557_v7 = vpop.f32.mrb[19].mxu0 }
 0x85c   : > { %v5453_v24 = vadd.f32 %v2557_v7, %v2484_v0  ;;  %v2626_v43 = vpop.f32.mrb[18].mxu1 }
 0x85d   : > { %v5455_v14 = vadd.f32 %v2626_v43, %v2484_v0  ;;  %v2628_v21 = vpop.f32.mrb[19].mxu1  ;;  %v2631_v22 = vmax.f32 %v5451_v11, 0.0  ;;  %v2674_v43 = vrot.slane %v4640_v26, %v5183_v49 }
 0x85e   : > { %v5458_v34 = vadd.f32 %v2628_v21, %v2484_v0  ;;  %v2632_v36 = vmax.f32 %v5453_v24, 0.0 }
 0x85f   : > { %2645 = vrot.lane.b32.xlu0 %v2631_v22, %s4915_s28  ;;  %v2633_v41 = vmax.f32 %v5455_v14, 0.0 }
 0x860   : > { %2647 = vrot.lane.b32.xlu1 %v2632_v36, %s4915_s28  ;;  %v2634_v17 = vmax.f32 %v5458_v34, 0.0 }
 0x863   : > { %2649 = vrot.lane.b32.xlu0 %v2633_v41, %s4915_s28 }
 0x864   : > { %2651 = vrot.lane.b32.xlu1 %v2634_v17, %s4915_s28  ;;  %s5894_s28 = sld [smem:[#allocation15_spill]] }
 0x867   : > { %2689 = vrot.lane.b32.xlu0 %v2632_v36, %s4916_s10 }
 0x868   : > { %2691 = vrot.lane.b32.xlu1 %v2633_v41, %s4916_s10 }
 0x86b   : > { %2687 = vrot.lane.b32.xlu0 %v2631_v22, %s4916_s10 }
 0x86c   : > { %2693 = vrot.lane.b32.xlu1 %v2634_v17, %s4916_s10  ;;  %s4917_s10 = smov 3  }
 0x86f   : > { %2731 = vperm.xlu0 %4859, %v2222_v12   ;;  %v2678_v12 = vrot.slane %v4640_v26, %v5178_v46 }
 0x870   : > { %2945 = vperm.xlu1 %4860, %v2224_v47  }
 0x873   : > { %3107 = vperm.xlu0 %4859, %v2229_v51   ;;  %v4641_v51 = vsel %vm2638_vm4, 1.0, %v4906_v1 }
 0x874   : > { %3112 = vperm.xlu1 %4860, %v2230_v58  }
 0x877   : > { %3117 = vperm.xlu0 %4859, %v2231_v57  }
 0x878   : > { %3122 = vperm.xlu1 %4860, %v2232_v9  }
 0x87b   : > { %3365 = vperm.xlu0 %4859, %v3348_v61  }
 0x8d1   : > { %v2646_v6 = vpop.permute.xlu0 %2645 }
 0x8d2   : > { %v2661_v10 = vsel %vm2653_vm3, 0.0, %v2646_v6  ;;  %v2648_v0 = vpop.permute.xlu1 %2647 }
 0x8d3   : > { %v2683_v15 = vmul.f32 %v2666_v27, %v2661_v10  ;;  %v2654_v7 = vsel %vm2653_vm3, %v2646_v6, %v2648_v0  ;;  %v2712_v27 = vrot.slane %v4641_v51, %v5181_v48 }
 0x8d4   : > { %v2684_v21 = vmul.f32 %v2670_v62, %v2654_v7 }
 0x8d5   : > { %v2650_v47 = vpop.permute.xlu0 %2649  ;;  %v4748_v61 = vpack.c.bf16 %v2631_v22, %v2683_v15  ;;  %v2716_v22 = vrot.slane %v4641_v51, %v5183_v49 }
 0x8d6   : > { %v2655_v58 = vsel %vm2653_vm3, %v2648_v0, %v2650_v47  ;;  %v2652_v57 = vpop.permute.xlu1 %2651  ;;  %v4746_v9 = vpack.c.bf16 %v2632_v36, %v2684_v21  ;;  %v2708_v0 = vrot.slane %v4641_v51, %v5176_v45 }
 0x8d7   : > { %v2685_v25 = vmul.f32 %v2674_v43, %v2655_v58  ;;  %v2656_v23 = vsel %vm2653_vm3, %v2650_v47, %v2652_v57 }
 0x8d8   : > { %v2686_v60 = vmul.f32 %v2678_v12, %v2656_v23  ;;  %4747 = vmatprep.subr.bf16.mxu0 %v4746_v9  ;;  %v2720_v23 = vrot.slane %v4641_v51, %v5178_v46  ;;  %v4644_v51 = vsel %vm2887_vm8, 1.0, %v4906_v1 }
 0x8d9   : > { %4749 = vmatpush1.bf16.msra.mxu0 %v4748_v61  ;;  %v2690_v62 = vpop.permute.xlu0 %2689  ;;  %v4752_v10 = vpack.c.bf16 %v2633_v41, %v2685_v25  ;;  %v2221_v41 = vld [vmem:[%s5886_s18] sm:$0xff]  ;;  %s5895_s18 = sld [smem:[#allocation14_spill]] }
 0x8da   : > { %v2692_v6 = vpop.permute.xlu1 %2691  ;;  %v4750_v26 = vpack.c.bf16 %v2634_v17, %v2686_v60 }
 0x8db   : > { %v2697_v7 = vsel %vm2695_vm6, %v2690_v62, %v2692_v6 }
 0x8dc   : > { %v2726_v36 = vmul.f32 %v2712_v27, %v2697_v7  ;;  %4751 = vmatprep.subr.bf16.mxu1 %v4750_v26  ;;  %v2897_v27 = vrot.slane %v4644_v51, %v5176_v45 }
 0x8dd   : > { %4753 = vmatpush1.bf16.msra.mxu1 %v4752_v10  ;;  %v2688_v15 = vpop.permute.xlu0 %2687 }
 0x8de   : > { %v2696_v43 = vsel %vm2695_vm6, %v2688_v15, %v2690_v62  ;;  %v2694_v21 = vpop.permute.xlu1 %2693  ;;  %2741 = vmatprep.subr.mxu0 %v2726_v36  ;;  %v4645_v15 = vsel %vm2890_vm9, 1.0, %v4906_v1 }
 0x8df   : > { %v2725_v12 = vmul.f32 %v2708_v0, %v2696_v43  ;;  %v2698_v17 = vsel %vm2695_vm6, %v2692_v6, %v2694_v21  ;;  %v2703_v25 = vsel %vm2695_vm6, %v2694_v21, 0.0  ;;  %v2901_v0 = vrot.slane %v4644_v51, %v5181_v48 }
 0x8e0   : > { %v2727_v47 = vmul.f32 %v2716_v22, %v2698_v17  ;;  %v2728_v58 = vmul.f32 %v2720_v23, %v2703_v25  ;;  %v2905_v22 = vrot.slane %v4644_v51, %v5183_v49  ;;  %v2909_v21 = vrot.slane %v4644_v51, %v5178_v46 }
 0x8e1   : > { %2742 = vmatpush1.msra.mxu0 %v2725_v12  ;;  %v2914_v12 = vmul.f32 0.0, %v2897_v27 }
 0x8e2   : > { %4642 = vmatmul.mubr.msk.f32.vlgmr.msra.gmra.mrb[20].mxu0 %vm1332_vm5, %v2221_v41  ;;  %2812 = vmatprep.subr.mxu1 %v2728_v58  ;;  %v2926_v58 = vrot.slane %v4645_v15, %v5181_v48 }
 0x8e3   : > { %2813 = vmatpush1.msra.mxu1 %v2727_v47  ;;  %3015 = vmatprep.mubr.f32.mxu0 %v4906_v1 }
 0x8e4   : > { %4643 = vmatmul.mubr.msk.f32.vlgmr.msra.gmra.mrb[20].mxu1 %vm1332_vm5, %v2221_v41 }
 0x8e5   : > { %3086 = vmatprep.mubr.f32.mxu1 %v4906_v1 }
 0x8ee   : > { %v2732_v57 = vpop.permute.xlu0 %2731 }
 0x9b5   : > { %v2803_v9 = vpop.f32.mrb[20].mxu0 }
 0x9b6   : > { %v2804_v61 = vadd.f32 %v2803_v9, %v2732_v57  ;;  %v2805_v60 = vpop.f32.mrb[21].mxu0  ;;  %v2934_v9 = vrot.slane %v4645_v15, %v5178_v46 }
 0x9b7   : > { %v2806_v62 = vadd.f32 %v2805_v60, %v2732_v57  ;;  %v2874_v6 = vpop.f32.mrb[20].mxu1 }
 0x9b8   : > { %v2879_v26 = vadd.f32 %v2804_v61, %v5451_v11  ;;  %v2875_v10 = vadd.f32 %v2874_v6, %v2732_v57  ;;  %v2876_v7 = vpop.f32.mrb[21].mxu1 }
 0x9b9   : > { %v2880_v36 = vadd.f32 %v2806_v62, %v5453_v24  ;;  %v2877_v23 = vadd.f32 %v2876_v7, %v2732_v57  ;;  %v2942_v7 = vmul.f32 0.0, %v2934_v9 }
 0x9ba   : > { %v2883_v43 = vmax.f32 %v2879_v26, 0.0  ;;  %v2881_v39 = vadd.f32 %v2875_v10, %v5455_v14  ;;  %v2922_v10 = vrot.slane %v4645_v15, %v5176_v45 }
 0x9bb   : > { %v2884_v17 = vmax.f32 %v2880_v36, 0.0  ;;  %v2882_v25 = vadd.f32 %v2877_v23, %v5458_v34  ;;  %v2930_v23 = vrot.slane %v4645_v15, %v5183_v49  ;;  %v2946_v15 = vpop.permute.xlu1 %2945 }
 0x9bc   : > { %v2885_v41 = vmax.f32 %v2881_v39, 0.0  ;;  %v2915_v47 = vmul.f32 %v2901_v0, %v2883_v43  ;;  %v4756_v6 = vpack.c.bf16 %v2883_v43, %v2914_v12 }
 0x9bd   : > { %v2916_v61 = vmul.f32 %v2905_v22, %v2884_v17  ;;  %v2886_v60 = vmax.f32 %v2882_v25, 0.0  ;;  %v2939_v18 = vmul.f32 %v2922_v10, %v2884_v17  ;;  %v2223_v22 = vld [vmem:[%s5887_s22] sm:$0xff]  ;;  %s5896_s22 = sld [smem:[#allocation17_spill]] }
 0x9be   : > { %v4754_v57 = vpack.c.bf16 %v2884_v17, %v2915_v47  ;;  %v2917_v62 = vmul.f32 %v2909_v21, %v2885_v41  ;;  %v2940_v51 = vmul.f32 %v2926_v58, %v2885_v41 }
 0x9bf   : > { %v4760_v0 = vpack.c.bf16 %v2885_v41, %v2916_v61  ;;  %v2941_v16 = vmul.f32 %v2930_v23, %v2886_v60 }
 0x9c0   : > { %4755 = vmatprep.subr.bf16.mxu0 %v4754_v57  ;;  %v4758_v27 = vpack.c.bf16 %v2886_v60, %v2917_v62 }
 0x9c1   : > { %4757 = vmatpush1.bf16.msra.mxu0 %v4756_v6 }
 0x9c2   : > { %2955 = vmatprep.subr.mxu0 %v2940_v51  ;;  %4759 = vmatprep.subr.bf16.mxu1 %v4758_v27 }
 0x9c3   : > { %4761 = vmatpush1.bf16.msra.mxu1 %v4760_v0 }
 0x9c4   : > { %3026 = vmatprep.subr.mxu1 %v2942_v7  ;;  %v2225_v7 = vld [vmem:[%s5888_s23] sm:$0xff] }
 0x9c5   : > { %2956 = vmatpush1.msra.mxu0 %v2939_v18 }
 0x9c6   : > { %4646 = vmatmul.mubr.msk.f32.vlgmr.msra.gmra.mrb[22].mxu0 %vm1332_vm5, %v2223_v22 }
 0x9c7   : > { %3027 = vmatpush1.msra.mxu1 %v2941_v16  ;;  %3201 = vmatprep.mubr.f32.mxu0 %v4906_v1 }
 0x9c8   : > { %4647 = vmatmul.mubr.msk.f32.vlgmr.msra.gmra.mrb[22].mxu1 %vm1332_vm5, %v2223_v22 }
 0x9c9   : > { %3290 = vmatprep.mubr.f32.mxu1 %v4906_v1 }
 0xa99   : > { %v3017_v43 = vpop.f32.mrb[22].mxu0 }
 0xa9a   : > { %v3018_v21 = vadd.f32 %v3017_v43, %v2946_v15  ;;  %v3019_v12 = vpop.f32.mrb[23].mxu0  ;;  %v3113_v43 = vpop.permute.xlu1 %3112 }
 0xa9b   : > { %v3020_v41 = vadd.f32 %v3019_v12, %v2946_v15  ;;  %v3088_v17 = vpop.f32.mrb[22].mxu1 }
 0xa9c   : > { %v3093_v47 = vadd.f32 %v3018_v21, %v5451_v11  ;;  %v3089_v58 = vadd.f32 %v3088_v17, %v2946_v15  ;;  %v3090_v18 = vpop.f32.mrb[23].mxu1 }
 0xa9d   : > { %v3094_v9 = vadd.f32 %v3020_v41, %v5453_v24  ;;  %v3091_v16 = vadd.f32 %v3090_v18, %v2946_v15  ;;  %v2226_v24 = vld [vmem:[%s5888_s23 + $0x8] sm:$0xff] }
 0xa9e   : > { %v3097_v61 = vadd.f32 %v3093_v47, %v2879_v26  ;;  %v3095_v60 = vadd.f32 %v3089_v58, %v5455_v14  ;;  %v2227_v14 = vld [vmem:[%s5888_s23 + $0x10] sm:$0xff]  ;;  %v3123_v2 = vpop.permute.xlu1 %3122 }
 0xa9f   : > { %v3096_v57 = vadd.f32 %v3091_v16, %v5458_v34  ;;  %v3098_v62 = vadd.f32 %v3094_v9, %v2880_v36  ;;  %v2228_v34 = vld [vmem:[%s5888_s23 + $0x18] sm:$0xff]  ;;  %v3108_v36 = vpop.permute.xlu0 %3107 }
 0xaa0   : > { %v3099_v6 = vadd.f32 %v3095_v60, %v2881_v39  ;;  %v3101_v27 = vmax.f32 %v3097_v61, 0.0 }
 0xaa1   : > { %v3102_v10 = vmax.f32 %v3098_v62, 0.0  ;;  %v3100_v51 = vadd.f32 %v3096_v57, %v2882_v25 }
 0xaa2   : > { %v3103_v23 = vmax.f32 %v3099_v6, 0.0 }
 0xaa3   : > { %3137 = vmatprep.subr.mxu0 %v3102_v10  ;;  %v3104_v11 = vmax.f32 %v3100_v51, 0.0  ;;  %v3118_v10 = vpop.permute.xlu0 %3117 }
 0xaa4   : > { %3138 = vmatpush1.msra.mxu0 %v3101_v27 }
 0xaa5   : > { %4648 = vmatmul.mubr.msk.f32.vlgmr.msra.gmra.mrb[24].mxu0 %vm1500_vm7, %v2225_v7  ;;  %3226 = vmatprep.subr.mxu1 %v3104_v11 }
 0xaa6   : > { %3227 = vmatpush1.msra.mxu1 %v3103_v23  ;;  %3207 = vmatprep.mubr.f32.mxu0 %v4906_v1 }
 0xaa7   : > { %4652 = vmatmul.mubr.msk.f32.vlgmr.msra.gmra.mrb[24].mxu1 %vm1500_vm7, %v2225_v7 }
 0xaa8   : > { %3296 = vmatprep.mubr.f32.mxu1 %v4906_v1 }
 0xaa9   : > { %4649 = vmatmul.mubr.msk.f32.gmra.mrb[26].mxu0 %vm1500_vm7, %v2226_v24 }
 0xaaa   : > { %3213 = vmatprep.mubr.f32.mxu0 %v4906_v1 }
 0xaab   : > { %4653 = vmatmul.mubr.msk.f32.gmra.mrb[26].mxu1 %vm1500_vm7, %v2226_v24 }
 0xaac   : > { %3302 = vmatprep.mubr.f32.mxu1 %v4906_v1 }
 0xaad   : > { %4650 = vmatmul.mubr.msk.f32.gmra.mrb[28].mxu0 %vm1500_vm7, %v2227_v14 }
 0xaae   : > { %3219 = vmatprep.mubr.f32.mxu0 %v4906_v1 }
 0xaaf   : > { %4654 = vmatmul.mubr.msk.f32.gmra.mrb[28].mxu1 %vm1500_vm7, %v2227_v14 }
 0xab0   : > { %3308 = vmatprep.mubr.f32.mxu1 %v4906_v1 }
 0xab1   : > { %4651 = vmatmul.mubr.msk.f32.gmra.mrb[30].mxu0 %vm1500_vm7, %v2228_v34 }
 0xab2   : > { %3435 = vmatprep.mubr.f32.mxu0 %v4906_v1 }
 0xab3   : > { %4655 = vmatmul.mubr.msk.f32.gmra.mrb[30].mxu1 %vm1500_vm7, %v2228_v34 }
 0xab4   : > { %3506 = vmatprep.mubr.f32.mxu1 %v4906_v1 }
 0xb78   : > { %v3203_v26 = vpop.f32.mrb[24].mxu0 }
 0xb79   : > { %v3205_v39 = vpop.f32.mrb[25].mxu0  ;;  %v3204_v22 = vadd.f32 %v3203_v26, %v3108_v36 }
 0xb7a   : > { %v3206_v25 = vadd.f32 %v3205_v39, %v3108_v36  ;;  %v3292_v0 = vpop.f32.mrb[24].mxu1 }
 0xb7b   : > { %v3294_v15 = vpop.f32.mrb[25].mxu1  ;;  %v3293_v41 = vadd.f32 %v3292_v0, %v3108_v36  ;;  %v5546_v16 = vadd.f32 %v3204_v22, %v2201_v4 }
 0xb7c   : > { %v3295_v21 = vadd.f32 %v3294_v15, %v3108_v36  ;;  %v3209_v12 = vpop.f32.mrb[26].mxu0  ;;  %v5542_v58 = vadd.f32 %v3206_v25, %v2202_v8 }
 0xb7d   : > { %v3210_v17 = vadd.f32 %v3209_v12, %v3113_v43  ;;  %v3211_v47 = vpop.f32.mrb[27].mxu0  ;;  %v5562_v32 = vadd.f32 %v3293_v41, %v2203_v29  ;;  %v3331_v63 = vmax.f32 %v5546_v16, 0.0  ;;  %v5889_v41 = vmax.f32 %v5374_v33, 0.0 }
 0xb7e   : > { %v3212_v18 = vadd.f32 %v3211_v47, %v3113_v43  ;;  %v3298_v9 = vpop.f32.mrb[26].mxu1  ;;  %v5554_v62 = vadd.f32 %v3295_v21, %v2204_v52  ;;  %v3332_v4 = vmax.f32 %v5542_v58, 0.0 }
 0xb7f   : > { %v5550_v61 = vadd.f32 %v3210_v17, %v2205_v54  ;;  %v3299_v60 = vadd.f32 %v3298_v9, %v3113_v43  ;;  %v3300_v57 = vpop.f32.mrb[27].mxu1 }
 0xb80   : > { %v5558_v40 = vadd.f32 %v3212_v18, %v2206_v59  ;;  %v3301_v8 = vadd.f32 %v3300_v57, %v3113_v43  ;;  %v3215_v6 = vpop.f32.mrb[28].mxu0 }
 0xb81   : > { %v3335_v31 = vmax.f32 %v5550_v61, 0.0  ;;  %v5567_v54 = vadd.f32 %v3299_v60, %v2207_v13  ;;  %v3217_v3 = vpop.f32.mrb[29].mxu0  ;;  %v3216_v27 = vadd.f32 %v3215_v6, %v3118_v10  ;;  %v3334_v13 = vmax.f32 %v5554_v62, 0.0 }
 0xb82   : > { %v3336_v44 = vmax.f32 %v5558_v40, 0.0  ;;  %v5573_v59 = vadd.f32 %v3301_v8, %v2208_v55  ;;  %v3218_v52 = vadd.f32 %v3217_v3, %v3118_v10  ;;  %v3304_v51 = vpop.f32.mrb[28].mxu1  ;;  %v3333_v55 = vmax.f32 %v5562_v32, 0.0 }
 0xb83   : > { %v3337_v29 = vmax.f32 %v5567_v54, 0.0  ;;  %v3306_v7 = vpop.f32.mrb[29].mxu1  ;;  %v4764_v14 = vpack.c.bf16 %v3335_v31, %v3331_v63  ;;  %v3305_v34 = vadd.f32 %v3304_v51, %v3118_v10  ;;  %v5602_v43 = vadd.f32 %v3216_v27, %v2209_v30  ;;  %v3366_v51 = vpop.permute.xlu0 %3365 }
 0xb84   : > { %v3338_v11 = vmax.f32 %v5573_v59, 0.0  ;;  %v3307_v23 = vadd.f32 %v3306_v7, %v3118_v10  ;;  %v3221_v24 = vpop.f32.mrb[30].mxu0  ;;  %v4762_v5 = vpack.c.bf16 %v3336_v44, %v3332_v4  ;;  %v5590_v39 = vadd.f32 %v3218_v52, %v2210_v37  ;;  %v3347_v52 = vld [vmem:[%s5892_s26] sm:$0xff]  ;;  %s4919_s26 = smov 24  }
 0xb85   : > { %v3222_v26 = vadd.f32 %v3221_v24, %v3123_v2  ;;  %v3223_v36 = vpop.f32.mrb[31].mxu0  ;;  %v4772_v15 = vpack.c.bf16 %v3337_v29, %v3333_v55  ;;  %v5618_v30 = vadd.f32 %v3305_v34, %v5890_v19  ;;  %v3339_v28 = vmax.f32 %v5602_v43, 0.0 }
 0xb86   : > { %v3224_v25 = vadd.f32 %v3223_v36, %v3123_v2  ;;  %v3310_v0 = vpop.f32.mrb[30].mxu1  ;;  %4763 = vmatprep.subr.bf16.mxu0 %v4762_v5  ;;  %v4770_v22 = vpack.c.bf16 %v3338_v11, %v3334_v13  ;;  %v5610_v12 = vadd.f32 %v3307_v23, %v2212_v56  ;;  %v3340_v38 = vmax.f32 %v5590_v39, 0.0 }
 0xb87   : > { %v5606_v53 = vadd.f32 %v3222_v26, %v2213_v35  ;;  %v3311_v37 = vadd.f32 %v3310_v0, %v3123_v2  ;;  %v3312_v21 = vpop.f32.mrb[31].mxu1  ;;  %4765 = vmatpush1.bf16.msra.mxu0 %v4764_v14  ;;  %v5891_v35 = vmax.f32 %v5395_v42, 0.0  ;;  %v5893_v56 = vmax.f32 %v5398_v50, 0.0 }
 0xb88   : > { %v5614_v17 = vadd.f32 %v3224_v25, %v5889_v41  ;;  %v3313_v47 = vadd.f32 %v3312_v21, %v3123_v2  ;;  %4771 = vmatprep.subr.bf16.mxu1 %v4770_v22  ;;  %v5857_v57 = vmax.f32 %v5610_v12, 0.0  ;;  %v5859_v6 = vmax.f32 %v5618_v30, 0.0  ;;  %v3350_v22 = vld [vmem:[%s5894_s28] sm:$0xff]  ;;  %s4920_s28 = smov 104  }
 0xb89   : > { %v5860_v20 = vmax.f32 %v5606_v53, 0.0  ;;  %v5623_v18 = vadd.f32 %v3311_v37, %v5891_v35  ;;  %4773 = vmatpush1.bf16.msra.mxu1 %v4772_v15  ;;  %v4861_v15 = vld [vmem:[%s4944_s17] sm:$0xf]  ;;  %v5899_v59 = vmax.f32 %v5606_v53, 0.0  ;;  %v5900_v39 = vmax.f32 %v5618_v30, 0.0 }
 0xb8a   : > { %v5858_v33 = vmax.f32 %v5614_v17, 0.0  ;;  %v5629_v9 = vadd.f32 %v3313_v47, %v5893_v56  ;;  %vm3520_vm12 = vcmp.lt.s32.totalorder %v4861_v15, 5 }
 0xb8b   : > { %v5856_v60 = vmax.f32 %v5623_v18, 0.0  ;;  %v4768_v50 = vpack.c.bf16 %v5860_v20, %v3339_v28 }
 0xb8c   : > { %v5855_v42 = vmax.f32 %v5629_v9, 0.0  ;;  %v4766_v8 = vpack.c.bf16 %v5858_v33, %v3340_v38 }
 0xb8d   : > { %v4776_v3 = vpack.c.bf16 %v5856_v60, %v5859_v6 }
 0xb8e   : > { %4767 = vmatprep.subr.bf16.mxu0 %v4766_v8  ;;  %v4774_v10 = vpack.c.bf16 %v5855_v42, %v5857_v57 }
 0xb8f   : > { %4769 = vmatpush1.bf16.msra.mxu0 %v4768_v50 }
 0xb90   : > { %4775 = vmatprep.subr.bf16.mxu1 %v4774_v10 }
 0xb91   : > { %4777 = vmatpush1.bf16.msra.mxu1 %v4776_v3 }
 0xb92   : > { %4656 = vmatmul.mubr.msk.f32.vlgmr.msra.gmra.mrb[32].mxu0 %vm1083_vm0, %v3347_v52 }
 0xb93   : > { %3683 = vmatprep.mubr.f32.mxu0 %v4906_v1 }
 0xb94   : > { %4657 = vmatmul.mubr.msk.f32.vlgmr.msra.gmra.mrb[32].mxu1 %vm1083_vm0, %v3347_v52  ;;  %vm3517_vm0 = vcmp.ge.s32.totalorder %v4861_v15, 3 }
 0xb95   : > { %3754 = vmatprep.mubr.f32.mxu1 %v4906_v1  ;;  %v4658_v37 = vsel %vm3517_vm0, 1.0, %v4906_v1 }
 0xb96   : > { %v3548_v21 = vrot.slane %v4658_v37, %v5176_v45  ;;  %v3552_v41 = vrot.slane %v4658_v37, %v5181_v48  ;;  %v3556_v50 = vrot.slane %v4658_v37, %v5183_v49  ;;  %v3560_v3 = vrot.slane %v4658_v37, %v5178_v46 }
 0xc65   : > { %v3437_v27 = vpop.f32.mrb[32].mxu0 }
 0xc66   : > { %v3438_v7 = vadd.f32 %v3437_v27, %v3366_v51  ;;  %v3439_v2 = vpop.f32.mrb[33].mxu0 }
 0xc67   : > { %v3440_v23 = vadd.f32 %v3439_v2, %v3366_v51  ;;  %v3508_v24 = vpop.f32.mrb[32].mxu1 }
 0xc68   : > { %v3513_v5 = vmax.f32 %v3438_v7, 0.0  ;;  %v3509_v14 = vadd.f32 %v3508_v24, %v3366_v51  ;;  %v3510_v34 = vpop.f32.mrb[33].mxu1 }
 0xc69   : > { %v3514_v26 = vmax.f32 %v3440_v23, 0.0  ;;  %v3511_v36 = vadd.f32 %v3510_v34, %v3366_v51  ;;  %v4659_v51 = vsel %vm3520_vm12, 1.0, %v4906_v1 }
 0xc6a   : > { %3527 = vrot.lane.b32.xlu1 %v3513_v5, %s4917_s10  ;;  %v3515_v25 = vmax.f32 %v3509_v14, 0.0 }
 0xc6b   : > { %3529 = vrot.lane.b32.xlu0 %v3514_v26, %s4917_s10  ;;  %v3516_v0 = vmax.f32 %v3511_v36, 0.0  ;;  %v3594_v36 = vrot.slane %v4659_v51, %v5181_v48 }
 0xc6e   : > { %3531 = vrot.lane.b32.xlu1 %v3515_v25, %s4917_s10 }
 0xc6f   : > { %3533 = vrot.lane.b32.xlu0 %v3516_v0, %s4917_s10  ;;  %s5897_s10 = sld [smem:[#allocation16_spill]] }
 0xc72   : > { %3571 = vrot.lane.b32.xlu1 %v3514_v26, %s4918_s11 }
 0xc73   : > { %3573 = vrot.lane.b32.xlu0 %v3515_v25, %s4918_s11 }
 0xc76   : > { %3569 = vrot.lane.b32.xlu1 %v3513_v5, %s4918_s11 }
 0xc77   : > { %3575 = vrot.lane.b32.xlu0 %v3516_v0, %s4918_s11  ;;  %s5796_s11 = scalar_lea.vmem %s5099_s12, %s4680_s0 }
 0xc7a   : > { %3613 = vperm.xlu1 %4860, %v3350_v22  }
 0xcdc   : > { %v3528_v47 = vpop.permute.xlu1 %3527 }
 0xcdd   : > { %v3543_v19 = vsel %vm3535_vm10, 0.0, %v3528_v47  ;;  %v3530_v35 = vpop.permute.xlu0 %3529 }
 0xcde   : > { %v3565_v56 = vmul.f32 %v3548_v21, %v3543_v19  ;;  %v3536_v8 = vsel %vm3535_vm10, %v3528_v47, %v3530_v35  ;;  %v3590_v47 = vrot.slane %v4659_v51, %v5176_v45  ;;  %v3602_v19 = vrot.slane %v4659_v51, %v5178_v46 }
 0xcdf   : > { %v3566_v10 = vmul.f32 %v3552_v41, %v3536_v8 }
 0xce0   : > { %v3532_v52 = vpop.permute.xlu1 %3531  ;;  %v4780_v23 = vpack.c.bf16 %v3513_v5, %v3565_v56  ;;  %v3598_v5 = vrot.slane %v4659_v51, %v5183_v49 }
 0xce1   : > { %v3537_v27 = vsel %vm3535_vm10, %v3530_v35, %v3532_v52  ;;  %v3534_v7 = vpop.permute.xlu0 %3533  ;;  %v4778_v2 = vpack.c.bf16 %v3514_v26, %v3566_v10  ;;  %v3349_v10 = vld [vmem:[%s5895_s18] sm:$0xff] }
 0xce2   : > { %v3567_v24 = vmul.f32 %v3556_v50, %v3537_v27  ;;  %v3538_v14 = vsel %vm3535_vm10, %v3532_v52, %v3534_v7 }
 0xce3   : > { %v3568_v34 = vmul.f32 %v3560_v3, %v3538_v14  ;;  %4779 = vmatprep.subr.bf16.mxu0 %v4778_v2 }
 0xce4   : > { %4781 = vmatpush1.bf16.msra.mxu0 %v4780_v23  ;;  %v3572_v22 = vpop.permute.xlu1 %3571  ;;  %v4784_v21 = vpack.c.bf16 %v3515_v25, %v3567_v24 }
 0xce5   : > { %v3574_v15 = vpop.permute.xlu0 %3573  ;;  %v4782_v37 = vpack.c.bf16 %v3516_v0, %v3568_v34 }
 0xce6   : > { %v3579_v41 = vsel %vm3577_vm13, %v3572_v22, %v3574_v15 }
 0xce7   : > { %v3608_v26 = vmul.f32 %v3594_v36, %v3579_v41  ;;  %4783 = vmatprep.subr.bf16.mxu1 %v4782_v37  ;;  %v3352_v41 = vld [vmem:[%s5896_s22] sm:$0xff] }
 0xce8   : > { %4785 = vmatpush1.bf16.msra.mxu1 %v4784_v21  ;;  %v3570_v35 = vpop.permute.xlu1 %3569 }
 0xce9   : > { %v3578_v56 = vsel %vm3577_vm13, %v3570_v35, %v3572_v22  ;;  %v3576_v8 = vpop.permute.xlu0 %3575  ;;  %3623 = vmatprep.subr.mxu0 %v3608_v26 }
 0xcea   : > { %v3607_v50 = vmul.f32 %v3590_v47, %v3578_v56  ;;  %v3580_v0 = vsel %vm3577_vm13, %v3574_v15, %v3576_v8  ;;  %v3585_v25 = vsel %vm3577_vm13, %v3576_v8, 0.0  ;;  %v4862_v47 = vld [vmem:[%s4939_s13] sm:$0xf] }
 0xceb   : > { %v3609_v3 = vmul.f32 %v3598_v5, %v3580_v0  ;;  %v3610_v52 = vmul.f32 %v3602_v19, %v3585_v25  ;;  %vm3765_vm14 = vcmp.ge.s32.totalorder %v4862_v47, 3  ;;  %vm3768_vm15 = vcmp.lt.s32.totalorder %v4862_v47, 5 }
 0xcec   : > { %3624 = vmatpush1.msra.mxu0 %v3607_v50  ;;  %v4662_v26 = vsel %vm3765_vm14, 1.0, %v4906_v1 }
 0xced   : > { %4660 = vmatmul.mubr.msk.f32.vlgmr.msra.gmra.mrb[34].mxu0 %vm1332_vm5, %v3349_v10  ;;  %3694 = vmatprep.subr.mxu1 %v3610_v52  ;;  %v3795_v5 = vrot.slane %v4662_v26, %v5176_v45  ;;  %v3799_v19 = vrot.slane %v4662_v26, %v5181_v48  ;;  %v3803_v25 = vrot.slane %v4662_v26, %v5183_v49 }
 0xcee   : > { %3695 = vmatpush1.msra.mxu1 %v3609_v3  ;;  %3930 = vmatprep.mubr.f32.mxu0 %v4906_v1  ;;  %v3807_v3 = vrot.slane %v4662_v26, %v5178_v46 }
 0xcef   : > { %4661 = vmatmul.mubr.msk.f32.vlgmr.msra.gmra.mrb[34].mxu1 %vm1332_vm5, %v3349_v10 }
 0xcf0   : > { %4001 = vmatprep.mubr.f32.mxu1 %v4906_v1 }
 0xcf9   : > { %v3614_v51 = vpop.permute.xlu1 %3613 }
 0xdc0   : > { %v3685_v27 = vpop.f32.mrb[34].mxu0 }
 0xdc1   : > { %v5682_v7 = vadd.f32 %v3685_v27, %v3614_v51  ;;  %v3687_v2 = vpop.f32.mrb[35].mxu0 }
 0xdc2   : > { %v5684_v23 = vadd.f32 %v3687_v2, %v3614_v51  ;;  %v3756_v24 = vpop.f32.mrb[34].mxu1 }
 0xdc3   : > { %v5686_v14 = vadd.f32 %v3756_v24, %v3614_v51  ;;  %v3758_v34 = vpop.f32.mrb[35].mxu1  ;;  %v3761_v36 = vmax.f32 %v5682_v7, 0.0 }
 0xdc4   : > { %v5689_v22 = vadd.f32 %v3758_v34, %v3614_v51  ;;  %v3762_v15 = vmax.f32 %v5684_v23, 0.0  ;;  %v4663_v51 = vsel %vm3768_vm15, 1.0, %v4906_v1 }
 0xdc5   : > { %3775 = vrot.lane.b32.xlu0 %v3761_v36, %s4919_s26  ;;  %v3763_v37 = vmax.f32 %v5686_v14, 0.0 }
 0xdc6   : > { %3777 = vrot.lane.b32.xlu1 %v3762_v15, %s4919_s26  ;;  %v3764_v21 = vmax.f32 %v5689_v22, 0.0 }
 0xdc9   : > { %3779 = vrot.lane.b32.xlu0 %v3763_v37, %s4919_s26 }
 0xdca   : > { %3781 = vrot.lane.b32.xlu1 %v3764_v21, %s4919_s26 }
 0xdcd   : > { %3818 = vrot.lane.b32.xlu0 %v3762_v15, %s4920_s28 }
 0xdce   : > { %3820 = vrot.lane.b32.xlu1 %v3763_v37, %s4920_s28 }
 0xdd1   : > { %3816 = vrot.lane.b32.xlu0 %v3761_v36, %s4920_s28 }
 0xdd2   : > { %3822 = vrot.lane.b32.xlu1 %v3764_v21, %s4920_s28 }
 0xdd5   : > { %3860 = vperm.xlu0 %4859, %v3352_v41  }
 0xe37   : > { %v3776_v35 = vpop.permute.xlu0 %3775 }
 0xe38   : > { %v3790_v56 = vsel %vm1332_vm5, 0.0, %v3776_v35  ;;  %v3778_v8 = vpop.permute.xlu1 %3777 }
 0xe39   : > { %v3812_v50 = vmul.f32 %v3795_v5, %v3790_v56  ;;  %v3783_v0 = vsel %vm1332_vm5, %v3776_v35, %v3778_v8  ;;  %v3841_v5 = vrot.slane %v4663_v51, %v5181_v48 }
 0xe3a   : > { %v3813_v10 = vmul.f32 %v3799_v19, %v3783_v0 }
 0xe3b   : > { %v3780_v52 = vpop.permute.xlu0 %3779  ;;  %v4788_v34 = vpack.c.bf16 %v3761_v36, %v3812_v50  ;;  %v3845_v36 = vrot.slane %v4663_v51, %v5183_v49 }
 0xe3c   : > { %v3784_v27 = vsel %vm1332_vm5, %v3778_v8, %v3780_v52  ;;  %v3782_v2 = vpop.permute.xlu1 %3781  ;;  %v4786_v24 = vpack.c.bf16 %v3762_v15, %v3813_v10  ;;  %v3837_v8 = vrot.slane %v4663_v51, %v5176_v45 }
 0xe3d   : > { %v3814_v41 = vmul.f32 %v3803_v25, %v3784_v27  ;;  %v3785_v42 = vsel %vm1332_vm5, %v3780_v52, %v3782_v2  ;;  %v3351_v52 = vld [vmem:[%s5897_s10] sm:$0xff] }
 0xe3e   : > { %v3815_v47 = vmul.f32 %v3807_v3, %v3785_v42  ;;  %4787 = vmatprep.subr.bf16.mxu0 %v4786_v24  ;;  %v3849_v42 = vrot.slane %v4663_v51, %v5178_v46 }
 0xe3f   : > { %4789 = vmatpush1.bf16.msra.mxu0 %v4788_v34  ;;  %v3819_v19 = vpop.permute.xlu0 %3818  ;;  %v4792_v56 = vpack.c.bf16 %v3763_v37, %v3814_v41 }
 0xe40   : > { %v3821_v35 = vpop.permute.xlu1 %3820  ;;  %v4790_v26 = vpack.c.bf16 %v3764_v21, %v3815_v47 }
 0xe41   : > { %v3826_v0 = vsel %vm3824_vm1, %v3819_v19, %v3821_v35 }
 0xe42   : > { %v3855_v15 = vmul.f32 %v3841_v5, %v3826_v0  ;;  %4791 = vmatprep.subr.bf16.mxu1 %v4790_v26 }
 0xe43   : > { %4793 = vmatpush1.bf16.msra.mxu1 %v4792_v56  ;;  %v3817_v50 = vpop.permute.xlu0 %3816 }
 0xe44   : > { %v3825_v25 = vsel %vm3824_vm1, %v3817_v50, %v3819_v19  ;;  %v3823_v10 = vpop.permute.xlu1 %3822  ;;  %3870 = vmatprep.subr.mxu0 %v3855_v15 }
 0xe45   : > { %v3854_v3 = vmul.f32 %v3837_v8, %v3825_v25  ;;  %v3827_v21 = vsel %vm3824_vm1, %v3821_v35, %v3823_v10  ;;  %v3832_v37 = vsel %vm3824_vm1, %v3823_v10, 0.0  ;;  %v3354_v10 = vld [vmem:[%s5084_s30] sm:$0xff] }
 0xe46   : > { %v3856_v27 = vmul.f32 %v3845_v36, %v3827_v21  ;;  %v3857_v2 = vmul.f32 %v3849_v42, %v3832_v37  ;;  %v3360_v21 = vld [vmem:[%s5094_s4 + $0x8] sm:$0xff]  ;;  %v3361_v37 = vld [vmem:[%s5094_s4 + $0x10] sm:$0xff] }
 0xe47   : > { %3871 = vmatpush1.msra.mxu0 %v3854_v3  ;;  %v3359_v3 = vld [vmem:[%s5094_s4] sm:$0xff] }
 0xe48   : > { %4664 = vmatmul.mubr.msk.f32.vlgmr.msra.gmra.mrb[36].mxu0 %vm1332_vm5, %v3351_v52  ;;  %3941 = vmatprep.subr.mxu1 %v3857_v2 }
 0xe49   : > { %3942 = vmatpush1.msra.mxu1 %v3856_v27  ;;  %4166 = vmatprep.mubr.f32.mxu0 %v4906_v1  ;;  %v4863_v27 = vld [vmem:[%s4934_s9] sm:$0xf] }
 0xe4a   : > { %4665 = vmatmul.mubr.msk.f32.vlgmr.msra.gmra.mrb[36].mxu1 %vm1332_vm5, %v3351_v52  ;;  %v3362_v52 = vld [vmem:[%s5094_s4 + $0x18] sm:$0xff]  ;;  %vm4016_vm2 = vcmp.ge.s32.totalorder %v4863_v27, 3  ;;  %vm4019_vm3 = vcmp.lt.s32.totalorder %v4863_v27, 5 }
 0xe4b   : > { %4237 = vmatprep.mubr.f32.mxu1 %v4906_v1  ;;  %v4666_v2 = vsel %vm4016_vm2, 1.0, %v4906_v1 }
 0xe54   : > { %v3861_v51 = vpop.permute.xlu0 %3860 }
 0xf1b   : > { %v3932_v24 = vpop.f32.mrb[36].mxu0 }
 0xf1c   : > { %v3933_v34 = vadd.f32 %v3932_v24, %v3861_v51  ;;  %v3934_v41 = vpop.f32.mrb[37].mxu0  ;;  %v4045_v24 = vrot.slane %v4666_v2, %v5181_v48 }
 0xf1d   : > { %v3935_v47 = vadd.f32 %v3934_v41, %v3861_v51  ;;  %v4003_v5 = vpop.f32.mrb[36].mxu1  ;;  %v4667_v41 = vsel %vm4019_vm3, 1.0, %v4906_v1 }
 0xf1e   : > { %v5720_v19 = vadd.f32 %v3933_v34, %v5682_v7  ;;  %v4004_v35 = vadd.f32 %v4003_v5, %v3861_v51  ;;  %v4005_v26 = vpop.f32.mrb[37].mxu1  ;;  %v4085_v27 = vrot.slane %v4667_v41, %v5178_v46 }
 0xf1f   : > { %v5723_v56 = vadd.f32 %v3935_v47, %v5684_v23  ;;  %v4006_v0 = vadd.f32 %v4005_v26, %v3861_v51  ;;  %v4041_v51 = vrot.slane %v4666_v2, %v5176_v45 }
 0xf20   : > { %v5726_v8 = vadd.f32 %v4004_v35, %v5686_v14  ;;  %v4012_v15 = vmax.f32 %v5720_v19, 0.0  ;;  %v4049_v35 = vrot.slane %v4666_v2, %v5183_v49 }
 0xf21   : > { %v5730_v36 = vadd.f32 %v4006_v0, %v5689_v22  ;;  %v4013_v42 = vmax.f32 %v5723_v56, 0.0  ;;  %v4058_v47 = vmul.f32 0.0, %v4041_v51  ;;  %v4073_v51 = vrot.slane %v4667_v41, %v5176_v45 }
 0xf22   : > { %4025 = vrot.lane.b32.xlu1 %v4012_v15, %s4912_s1  ;;  %v4014_v50 = vmax.f32 %v5726_v8, 0.0 }
 0xf23   : > { %4027 = vrot.lane.b32.xlu0 %v4013_v42, %s4912_s1  ;;  %v4015_v25 = vmax.f32 %v5730_v36, 0.0  ;;  %v4796_v60 = vpack.c.bf16 %v4012_v15, %v4058_v47 }
 0xf26   : > { %4029 = vrot.lane.b32.xlu1 %v4014_v50, %s4912_s1 }
 0xf27   : > { %4063 = vrot.lane.b32.xlu0 %v4015_v25, %s4912_s1  ;;  %s5898_s1 = sld [smem:[#allocation18_spill]] }
 0xf2a   : > { %4096 = vperm.xlu1 %4860, %v3354_v10  }
 0xf2b   : > { %4258 = vperm.xlu0 %4859, %v3359_v3   ;;  %v4053_v3 = vrot.slane %v4666_v2, %v5178_v46  ;;  %v4081_v46 = vrot.slane %v4667_v41, %v5183_v49 }
 0xf2d   : > { %v3353_v15 = vld [vmem:[%s5898_s1] sm:$0xff] }
 0xf2e   : > { %4263 = vperm.xlu1 %4860, %v3360_v21   ;;  %v4077_v21 = vrot.slane %v4667_v41, %v5181_v48  ;;  %v4093_v48 = vmul.f32 0.0, %v4085_v27 }
 0xf2f   : > { %4268 = vperm.xlu0 %4859, %v3361_v37  }
 0xf32   : > { %4273 = vperm.xlu1 %4860, %v3362_v52  }
 0xf94   : > { %v4026_v34 = vpop.permute.xlu1 %4025 }
 0xf95   : > { %v4036_v5 = vsel %vm1752_vm11, 0.0, %v4026_v34  ;;  %v4028_v26 = vpop.permute.xlu0 %4027 }
 0xf96   : > { %v4059_v0 = vmul.f32 %v4045_v24, %v4036_v5  ;;  %v4031_v10 = vsel %vm1752_vm11, %v4026_v34, %v4028_v26 }
 0xf97   : > { %v4060_v57 = vmul.f32 %v4049_v35, %v4031_v10 }
 0xf98   : > { %v4030_v37 = vpop.permute.xlu1 %4029  ;;  %v4794_v52 = vpack.c.bf16 %v4013_v42, %v4059_v0 }
 0xf99   : > { %v4032_v33 = vsel %vm1752_vm11, %v4028_v26, %v4030_v37  ;;  %v4064_v6 = vpop.permute.xlu0 %4063  ;;  %v4800_v5 = vpack.c.bf16 %v4014_v50, %v4060_v57 }
 0xf9a   : > { %v4061_v20 = vmul.f32 %v4053_v3, %v4032_v33  ;;  %v4065_v24 = vsel %vm1752_vm11, %v4030_v37, %v4064_v6  ;;  %4795 = vmatprep.subr.bf16.mxu0 %v4794_v52  ;;  %v4090_v42 = vmul.f32 %v4073_v51, %v4032_v33  ;;  %v4068_v47 = vsel %vm1752_vm11, %v4064_v6, 0.0 }
 0xf9b   : > { %v4091_v34 = vmul.f32 %v4077_v21, %v4065_v24  ;;  %4797 = vmatpush1.bf16.msra.mxu0 %v4796_v60  ;;  %v4092_v45 = vmul.f32 %v4081_v46, %v4068_v47 }
 0xf9c   : > { %v4798_v2 = vpack.c.bf16 %v4015_v25, %v4061_v20 }
 0xf9d   : > { %4106 = vmatprep.subr.mxu0 %v4091_v34 }
 0xf9e   : > { %4799 = vmatprep.subr.bf16.mxu1 %v4798_v2 }
 0xf9f   : > { %4107 = vmatpush1.msra.mxu0 %v4090_v42  ;;  %4801 = vmatpush1.bf16.msra.mxu1 %v4800_v5 }
 0xfa0   : > { %4668 = vmatmul.mubr.msk.f32.vlgmr.msra.gmra.mrb[38].mxu0 %vm1332_vm5, %v3353_v15  ;;  %4177 = vmatprep.subr.mxu1 %v4093_v48 }
 0xfa1   : > { %4352 = vmatprep.mubr.f32.mxu0 %v4906_v1 }
 0xfa3   : > { %4178 = vmatpush1.msra.mxu1 %v4092_v45 }
 0xfa4   : > { %4669 = vmatmul.mubr.msk.f32.vlgmr.msra.gmra.mrb[38].mxu1 %vm1332_vm5, %v3353_v15 }
 0xfa5   : > { %4441 = vmatprep.mubr.f32.mxu1 %v4906_v1 }
 0xfa9   : > { %v4097_v20 = vpop.permute.xlu1 %4096 }
 0xfad   : > { %v4264_v48 = vpop.permute.xlu1 %4263 }
0x1073   : > { %v4168_v49 = vpop.f32.mrb[38].mxu0 }
0x1074   : > { %v4169_v33 = vadd.f32 %v4168_v49, %v4097_v20  ;;  %v4170_v60 = vpop.f32.mrb[39].mxu0 }
0x1075   : > { %v4171_v57 = vadd.f32 %v4170_v60, %v4097_v20 }
0x1076   : > { %v4244_v6 = vadd.f32 %v4169_v33, %v5682_v7  ;;  %v3355_v7 = vld [vmem:[%s5089_s27] sm:$0xff] }
0x1077   : > { %v4245_v50 = vadd.f32 %v4171_v57, %v5684_v23  ;;  %v4239_v25 = vpop.f32.mrb[38].mxu1 }
0x1078   : > { %v4248_v41 = vadd.f32 %v4244_v6, %v5720_v19  ;;  %v4240_v35 = vadd.f32 %v4239_v25, %v4097_v20  ;;  %v4241_v26 = vpop.f32.mrb[39].mxu1 }
0x1079   : > { %v4242_v0 = vadd.f32 %v4241_v26, %v4097_v20  ;;  %v4249_v10 = vadd.f32 %v4245_v50, %v5723_v56  ;;  %v3358_v56 = vld [vmem:[%s5089_s27 + $0x18] sm:$0xff] }
0x107a   : > { %v4246_v3 = vadd.f32 %v4240_v35, %v5686_v14  ;;  %v4252_v52 = vmax.f32 %v4248_v41, 0.0  ;;  %v3356_v14 = vld [vmem:[%s5089_s27 + $0x8] sm:$0xff] }
0x107b   : > { %v4247_v21 = vadd.f32 %v4242_v0, %v5689_v22  ;;  %v4253_v37 = vmax.f32 %v4249_v10, 0.0  ;;  %v3357_v22 = vld [vmem:[%s5089_s27 + $0x10] sm:$0xff] }
0x107c   : > { %v4250_v27 = vadd.f32 %v4246_v3, %v5726_v8  ;;  %v4259_v8 = vpop.permute.xlu0 %4258  ;;  %v4274_v3 = vpop.permute.xlu1 %4273 }
0x107d   : > { %4288 = vmatprep.subr.mxu0 %v4253_v37  ;;  %v4251_v23 = vadd.f32 %v4247_v21, %v5730_v36 }
0x107e   : > { %4289 = vmatpush1.msra.mxu0 %v4252_v52  ;;  %v4254_v51 = vmax.f32 %v4250_v27, 0.0 }
0x107f   : > { %4670 = vmatmul.mubr.msk.f32.vlgmr.msra.gmra.mrb[40].mxu0 %vm1500_vm7, %v3355_v7  ;;  %v4255_v19 = vmax.f32 %v4251_v23, 0.0 }
0x1080   : > { %4358 = vmatprep.mubr.f32.mxu0 %v4906_v1  ;;  %v4269_v16 = vpop.permute.xlu0 %4268 }
0x1081   : > { %4377 = vmatprep.subr.mxu1 %v4255_v19 }
0x1082   : > { %4378 = vmatpush1.msra.mxu1 %v4254_v51 }
0x1083   : > { %4671 = vmatmul.mubr.msk.f32.gmra.mrb[42].mxu0 %vm1500_vm7, %v3356_v14  ;;  %4674 = vmatmul.mubr.msk.f32.vlgmr.msra.gmra.mrb[40].mxu1 %vm1500_vm7, %v3355_v7 }
0x1084   : > { %4364 = vmatprep.mubr.f32.mxu0 %v4906_v1  ;;  %4447 = vmatprep.mubr.f32.mxu1 %v4906_v1 }
0x1087   : > { %4672 = vmatmul.mubr.msk.f32.gmra.mrb[44].mxu0 %vm1500_vm7, %v3357_v22  ;;  %4675 = vmatmul.mubr.msk.f32.gmra.mrb[42].mxu1 %vm1500_vm7, %v3356_v14 }
0x1088   : > { %4370 = vmatprep.mubr.f32.mxu0 %v4906_v1  ;;  %4453 = vmatprep.mubr.f32.mxu1 %v4906_v1 }
0x108b   : > { %4673 = vmatmul.mubr.msk.f32.gmra.mrb[46].mxu0 %vm1500_vm7, %v3358_v56  ;;  %4676 = vmatmul.mubr.msk.f32.gmra.mrb[44].mxu1 %vm1500_vm7, %v3357_v22  ;;  %v5901_v22 = vmax.f32 %v5614_v17, 0.0 }
0x108c   : > { %4459 = vmatprep.mubr.f32.mxu1 %v4906_v1 }
0x108f   : > { %4677 = vmatmul.mubr.msk.f32.gmra.mrb[46].mxu1 %vm1500_vm7, %v3358_v56 }
0x1152   : > { %v4354_v36 = vpop.f32.mrb[40].mxu0 }
0x1153   : > { %v4355_v24 = vadd.f32 %v4354_v36, %v4259_v8  ;;  %v4356_v34 = vpop.f32.mrb[41].mxu0 }
0x1154   : > { %v4357_v2 = vadd.f32 %v4356_v34, %v4259_v8 }
0x1155   : > { %v4466_v5 = vadd.f32 %v4355_v24, %v3331_v63 }
0x1156   : > { %v4467_v42 = vadd.f32 %v4357_v2, %v3332_v4  ;;  %v4360_v1 = vpop.f32.mrb[42].mxu0  ;;  %v4443_v46 = vpop.f32.mrb[40].mxu1 }
0x1157   : > { %v4482_v15 = vmax.f32 %v4466_v5, 0.0  ;;  %v4361_v47 = vadd.f32 %v4360_v1, %v4264_v48  ;;  %v4444_v45 = vadd.f32 %v4443_v46, %v4259_v8  ;;  %v4362_v20 = vpop.f32.mrb[43].mxu0  ;;  %v4445_v49 = vpop.f32.mrb[41].mxu1  ;;  %v5903_v1 = vmax.f32 %v5623_v18, 0.0 }
0x1158   : > { %v4483_v33 = vmax.f32 %v4467_v42, 0.0  ;;  %v4363_v60 = vadd.f32 %v4362_v20, %v4264_v48  ;;  %v4446_v57 = vadd.f32 %v4445_v49, %v4259_v8  ;;  %v5902_v8 = vmax.f32 %v5610_v12, 0.0 }
0x1159   : > { %4498 = vst [vmem:[%s5796_s11] sm:$0xff] %v4482_v15  ;;  %v4470_v63 = vadd.f32 %v4361_v47, %v3335_v31  ;;  %v4468_v58 = vadd.f32 %v4444_v45, %v3333_v55  ;;  %v5904_v12 = vmax.f32 %v5629_v9, 0.0 }
0x115a   : > { %4499 = vst [vmem:[%s5796_s11 + $0x8] sm:$0xff] %v4483_v33  ;;  %v4471_v4 = vadd.f32 %v4363_v60, %v3336_v44  ;;  %v4469_v6 = vadd.f32 %v4446_v57, %v3334_v13  ;;  %v4366_v50 = vpop.f32.mrb[44].mxu0  ;;  %v4449_v25 = vpop.f32.mrb[42].mxu1 }
0x115b   : > { %v4486_v41 = vmax.f32 %v4470_v63, 0.0  ;;  %v4484_v35 = vmax.f32 %v4468_v58, 0.0  ;;  %v4367_v61 = vadd.f32 %v4366_v50, %v4269_v16  ;;  %v4450_v31 = vadd.f32 %v4449_v25, %v4264_v48  ;;  %v4368_v26 = vpop.f32.mrb[45].mxu0  ;;  %v4451_v32 = vpop.f32.mrb[43].mxu1 }
0x115c   : > { %v4487_v55 = vmax.f32 %v4471_v4, 0.0  ;;  %v4485_v0 = vmax.f32 %v4469_v6, 0.0  ;;  %v4369_v10 = vadd.f32 %v4368_v26, %v4269_v16  ;;  %v4452_v40 = vadd.f32 %v4451_v32, %v4264_v48 }
0x115d   : > { %4502 = vst [vmem:[%s5796_s11 + $0x20] sm:$0xff] %v4486_v41  ;;  %4500 = vst [vmem:[%s5796_s11 + $0x10] sm:$0xff] %v4484_v35  ;;  %v4474_v62 = vadd.f32 %v4367_v61, %v3339_v28  ;;  %v4472_v44 = vadd.f32 %v4450_v31, %v3337_v29 }
0x115e   : > { %4503 = vst [vmem:[%s5796_s11 + $0x28] sm:$0xff] %v4487_v55  ;;  %4501 = vst [vmem:[%s5796_s11 + $0x18] sm:$0xff] %v4485_v0  ;;  %v4475_v13 = vadd.f32 %v4369_v10, %v3340_v38  ;;  %v4473_v21 = vadd.f32 %v4452_v40, %v3338_v11  ;;  %v4372_v37 = vpop.f32.mrb[46].mxu0  ;;  %v4455_v52 = vpop.f32.mrb[44].mxu1 }
0x115f   : > { %v4490_v27 = vmax.f32 %v4474_v62, 0.0  ;;  %v4488_v43 = vmax.f32 %v4472_v44, 0.0  ;;  %v4373_v28 = vadd.f32 %v4372_v37, %v4274_v3  ;;  %v4456_v7 = vadd.f32 %v4455_v52, %v4269_v16  ;;  %v4374_v54 = vpop.f32.mrb[47].mxu0  ;;  %v4457_v29 = vpop.f32.mrb[45].mxu1 }
0x1160   : > { %v4491_v23 = vmax.f32 %v4475_v13, 0.0  ;;  %v4489_v19 = vmax.f32 %v4473_v21, 0.0  ;;  %v4375_v51 = vadd.f32 %v4374_v54, %v4274_v3  ;;  %v4458_v14 = vadd.f32 %v4457_v29, %v4269_v16 }
0x1161   : > { %4506 = vst [vmem:[%s5796_s11 + $0x40] sm:$0xff] %v4490_v27  ;;  %4504 = vst [vmem:[%s5796_s11 + $0x30] sm:$0xff] %v4488_v43  ;;  %v4478_v11 = vadd.f32 %v4373_v28, %v5899_v59  ;;  %v4476_v38 = vadd.f32 %v4456_v7, %v5900_v39 }
0x1162   : > { %4507 = vst [vmem:[%s5796_s11 + $0x48] sm:$0xff] %v4491_v23  ;;  %4505 = vst [vmem:[%s5796_s11 + $0x38] sm:$0xff] %v4489_v19  ;;  %v4479_v56 = vadd.f32 %v4375_v51, %v5901_v22  ;;  %v4477_v36 = vadd.f32 %v4458_v14, %v5902_v8  ;;  %v4461_v24 = vpop.f32.mrb[46].mxu1 }
0x1163   : > { %v4494_v34 = vmax.f32 %v4478_v11, 0.0  ;;  %v4492_v53 = vmax.f32 %v4476_v38, 0.0  ;;  %v4462_v2 = vadd.f32 %v4461_v24, %v4274_v3  ;;  %v4463_v48 = vpop.f32.mrb[47].mxu1 }
0x1164   : > { %v4495_v5 = vmax.f32 %v4479_v56, 0.0  ;;  %v4493_v30 = vmax.f32 %v4477_v36, 0.0  ;;  %v4464_v42 = vadd.f32 %v4463_v48, %v4274_v3 }
0x1165   : > { %4510 = vst [vmem:[%s5796_s11 + $0x60] sm:$0xff] %v4494_v34  ;;  %4508 = vst [vmem:[%s5796_s11 + $0x50] sm:$0xff] %v4492_v53  ;;  %v4480_v46 = vadd.f32 %v4462_v2, %v5903_v1 }
0x1166   : > { %4511 = vst [vmem:[%s5796_s11 + $0x68] sm:$0xff] %v4495_v5  ;;  %4509 = vst [vmem:[%s5796_s11 + $0x58] sm:$0xff] %v4493_v30  ;;  %v4481_v17 = vadd.f32 %v4464_v42, %v5904_v12 }
0x1167   : > { %v4496_v15 = vmax.f32 %v4480_v46, 0.0 }
0x1168   : > { %v4497_v47 = vmax.f32 %v4481_v17, 0.0 }
0x1169   : > { %4512 = vst [vmem:[%s5796_s11 + $0x70] sm:$0xff] %v4496_v15 }
0x116a   : > { %4513 = vst [vmem:[%s5796_s11 + $0x78] sm:$0xff] %v4497_v47 }
0x116b PF: > { %s79_s15 = sadd.s32 1, %s4870_s15  }
0x116c   : > { %p76_p4 = scmp.ge.s32.totalorder %s79_s15, 4  }
0x116e   :  { %78 = sbr.rel (!%p76_p4) target bundleno = 53 (0x35), region = 220 }

</bundles_post_ra>
